<compile_context>
chip_gen: v5e
topology: v5e:2x2
jax: 0.10.0
libtpu: 0.0.40
codegen_flags: <defaults>
</compile_context>

<pallas_src>
import functools

import numpy as np
import jax
import jax.numpy as jnp
from jax import lax
from jax.experimental import pallas as pl
from jax.experimental.pallas import tpu as pltpu


# ----------------------------------------------------------------------------------
# Deterministic RedFB initializers (NumPy mirrors of the PyTorch helpers)
# ----------------------------------------------------------------------------------
def redfb_feedback_init(n, fb_type="pos", ff=False, start=0.5, stop=0.5):
    assert n % 2 == 0
    w = np.zeros((n, n), dtype=np.float32)
    seq = np.linspace(start, stop, n // 2)
    for i in range(n):
        if i % 2 == 0:
            w[i, i + 1] = seq[i // 2]
        elif fb_type == "neg":
            w[i, i - 1] = -seq[i // 2]
        else:
            w[i, i - 1] = seq[i // 2]
    if ff:
        for i in range(n):
            if i % 2 == 0 and i + 2 < n:
                w[i, i + 2] = 0.1
    return w


def redfb_source_init(n, m, start=1.0, stop=1.0):
    # remainder_init=True branch of the PyTorch code: n = input_size, m = hidden_size
    assert 2 * n <= m
    n_loop = m // (2 * n)
    gain = np.linspace(start, stop, n_loop * n)
    parts = []
    for i in range(n_loop):
        blk = np.zeros((2 * n, n), dtype=np.float32)
        for j in range(n):
            g = gain[i * n + j]
            blk[2 * j, j] = g
            blk[2 * j + 1, j] = g
        parts.append(blk)
    parts.append(np.zeros((m - 2 * n * n_loop, n), dtype=np.float32))
    return np.concatenate(parts, axis=0)


def block_diag_np(blocks):
    R = sum(b.shape[0] for b in blocks)
    C = sum(b.shape[1] for b in blocks)
    out = np.zeros((R, C), dtype=np.float32)
    r = c = 0
    for b in blocks:
        out[r:r + b.shape[0], c:c + b.shape[1]] = b
        r += b.shape[0]
        c += b.shape[1]
    return out


def build_params(input_size, d_model, num_rnn, num_heads, vocab_size, key):
    # MultiScaleMemoryLayerParallel.init_weights('half', t_a=1, t_b=700)
    half_life = np.linspace(700.0, 1.0, num_rnn)
    arange_hid = np.exp(np.log(0.5) / half_life)
    w_ih = np.concatenate(
        [redfb_source_init(input_size, d_model, 1.0, 1.0) for _ in range(num_rnn)],
        axis=0)                                                        # (num_rnn*H, I)
    w_hh = block_diag_np(
        [redfb_feedback_init(d_model, "pos", False, a, a) for a in arange_hid])
    mask = block_diag_np([np.ones((d_model, d_model), np.float32)] * num_rnn)
    w_hh = w_hh * mask   # forward() re-applies the block-diag mask each call

    # --- sparse structure of W_hh: one non-zero per row (even/odd pair feedback) ---
    NH = w_hh.shape[0]
    idx = np.arange(NH)
    sup = np.concatenate([np.diag(w_hh, 1), [0.0]]).astype(np.float32)   # w_hh[i, i+1]
    sub = np.concatenate([[0.0], np.diag(w_hh, -1)]).astype(np.float32)  # w_hh[i, i-1]
    c_hh = np.where(idx % 2 == 0, sup, sub).astype(np.float32)           # feedback gains
    # structural guard: W_hh really is the pure even/odd pair-swap with these gains
    recon = np.zeros_like(w_hh)
    ev, od = idx[idx % 2 == 0], idx[idx % 2 == 1]
    recon[ev, ev + 1] = c_hh[ev]
    recon[od, od - 1] = c_hh[od]
    assert np.allclose(recon, w_hh), "W_hh is not a pure RedFB pair-feedback matrix"
    # pair-swapped input projection rows (realises P @ W_ih for the carried u = P h)
    w_ih_sw = np.ascontiguousarray(
        w_ih.reshape(NH // 2, 2, input_size)[:, ::-1, :].reshape(NH, input_size))

    H = d_model
    ks = jax.random.split(key, 7)
    wq = jax.random.normal(ks[0], (H, H), jnp.float32) / np.sqrt(H)
    wk = jax.random.normal(ks[1], (H, H), jnp.float32) / np.sqrt(H)
    wv = jax.random.normal(ks[2], (H, H), jnp.float32) / np.sqrt(H)
    wo = jax.random.normal(ks[3], (H, H), jnp.float32) / np.sqrt(H)
    w1 = jax.random.normal(ks[4], (4 * H, H), jnp.float32) / np.sqrt(H)
    w2 = jax.random.normal(ks[5], (H, 4 * H), jnp.float32) / np.sqrt(4 * H)
    w_head = jax.random.normal(ks[6], (vocab_size, num_rnn * H), jnp.float32) / np.sqrt(num_rnn * H)
    return dict(w_ih=jnp.asarray(w_ih), w_hh=jnp.asarray(w_hh),
                w_ih_sw=jnp.asarray(w_ih_sw),
                c_hh=jnp.asarray(c_hh.reshape(1, NH)),
                wq=wq, wk=wk, wv=wv, wo=wo, w1=w1, w2=w2, w_head=w_head)


# ----------------------------------------------------------------------------------
# Kernel 1: multi-scale RNN recurrence.  Time is a sequential ("arbitrary") grid axis,
# tiled by T_TILE steps per grid iteration (static in-kernel loop) to amortise the
# per-grid-step pipeline overhead; batch tiles form a leading "parallel" axis.  The
# feedback is pure element-wise work thanks to the carried pair-swapped state u = P h:
#     h_{t+1} = relu(pre_t    + c * u_t)
#     u_{t+1} = relu(P(pre)_t + c * h_t)     (== P h_{t+1})
# ----------------------------------------------------------------------------------
def rnn_step_kernel(pre_ref, pre_sw_ref, c_ref, out_ref, h_scr, u_scr):
    @pl.when(pl.program_id(1) == 0)
    def _():
        h_scr[...] = jnp.zeros_like(h_scr)        # h_0 = 0  (and u_0 = P h_0 = 0)
        u_scr[...] = jnp.zeros_like(u_scr)

    c = c_ref[...]                                # (1, NH) feedback gains
    h = h_scr[...]                                # (BB, NH)
    u = u_scr[...]                                # (BB, NH) == P h
    tt = pre_ref.shape[0]                         # static time tile
    for t in range(tt):                           # sequential recurrence, VPU only
        h_new = jnp.maximum(pre_ref[t] + c * u, 0.0)      # relu(x W_ih^T + h W_hh^T)
        u_new = jnp.maximum(pre_sw_ref[t] + c * h, 0.0)   # = P h_new
        out_ref[t] = h_new
        h, u = h_new, u_new
    h_scr[...] = h
    u_scr[...] = u


def _pick_time_tile(T, cap=16):
    for tt in range(min(T, cap), 0, -1):
        if T % tt == 0:
            return tt
    return 1


def msm_parallel_rnn(pre_tbh, pre_sw_tbh, c_hh, *, batch_tile=8, time_tile=None):
    T, Bp, NH = pre_tbh.shape
    assert Bp % batch_tile == 0
    if time_tile is None:
        time_tile = _pick_time_tile(T)
    assert T % time_tile == 0

    def tb_spec():
        return pl.BlockSpec((time_tile, batch_tile, NH), lambda b, t: (t, b, 0))

    return pl.pallas_call(
        rnn_step_kernel,
        out_shape=jax.ShapeDtypeStruct((T, Bp, NH), jnp.float32),
        grid_spec=pltpu.PrefetchScalarGridSpec(
            num_scalar_prefetch=0,
            grid=(Bp // batch_tile, T // time_tile),
            in_specs=[tb_spec(), tb_spec(),
                      pl.BlockSpec((1, NH), lambda b, t: (0, 0))],
            out_specs=tb_spec(),
            scratch_shapes=[pltpu.VMEM((batch_tile, NH), jnp.float32),
                            pltpu.VMEM((batch_tile, NH), jnp.float32)]),
        compiler_params=pltpu.CompilerParams(
            dimension_semantics=("parallel", "arbitrary")),
    )(pre_tbh, pre_sw_tbh, c_hh)


# ----------------------------------------------------------------------------------
# Kernel 2: fused attention readout (MHA + residual + GELU-FF + residual) + linear head,
# batched over seq_tile sequences of num_rnn tokens per grid step.
# ----------------------------------------------------------------------------------
def _gelu_tanh(x):
    # tanh-approximate GELU (tanh runs on the EUP); |err| vs exact-erf GELU <~ 3e-3.
    c0 = 0.7978845608028654  # sqrt(2/pi)
    return 0.5 * x * (1.0 + jnp.tanh(c0 * (x + 0.044715 * x * x * x)))


def attn_readout_head_kernel(h_ref, wqkvt_ref, wot_ref, w1t_ref, w2t_ref, wht_ref,
                             sbias_ref, perm_ref, o_ref,
                             *, num_heads, num_rnn):
    hf = h_ref[...]                                       # (A, H), A = TS * num_rnn
    A, H = hf.shape
    TS, V = o_ref.shape
    hd = H // num_heads
    scale = 1.0 / float(np.sqrt(hd))

    # Fused QKV projection: one wide GEMM over all TS*N tokens of this block.
    qkv = jnp.dot(hf, wqkvt_ref[...], preferred_element_type=jnp.float32)  # (A, 3H)
    sbias = sbias_ref[...]                                # (A, A): 0 in-sequence, -1e30 off

    heads = []
    for i in range(num_heads):                            # static unroll, heads packed in H
        q = qkv[:, i * hd:(i + 1) * hd] * scale
        k = qkv[:, H + i * hd:H + (i + 1) * hd]
        v = qkv[:, 2 * H + i * hd:2 * H + (i + 1) * hd]
        s = lax.dot_general(q, k, (((1,), (1,)), ((), ())),
                            preferred_element_type=jnp.float32)           # (A, A)
        s = s + sbias                                     # sequence block-diagonal mask
        s = s - jnp.max(s, axis=-1, keepdims=True)
        e = jnp.exp(s)
        p = e * pl.reciprocal(jnp.sum(e, axis=-1, keepdims=True), approx=True)
        heads.append(jnp.dot(p, v, preferred_element_type=jnp.float32))   # (A, hd)
    ctx = jnp.concatenate(heads, axis=-1)                                 # (A, H)
    attn = jnp.dot(ctx, wot_ref[...], preferred_element_type=jnp.float32)

    h1 = hf + attn                                        # residual 1
    f = jnp.dot(h1, w1t_ref[...], preferred_element_type=jnp.float32)     # (A, 4H)
    f2 = jnp.dot(_gelu_tanh(f), w2t_ref[...], preferred_element_type=jnp.float32)
    h2 = h1 + f2                                          # residual 2, (A, H)

    # Linear head: gather token position n of every sequence with one 0/1 permutation
    # matmul (g[n*TS + s] = h2[s*N + n]), then per-position (TS,H)x(H,V) GEMMs summed.
    g = jnp.dot(perm_ref[...], h2, preferred_element_type=jnp.float32)    # (A, H)
    z = jnp.zeros((TS, V), jnp.float32)
    for n in range(num_rnn):
        z = z + jnp.dot(g[n * TS:(n + 1) * TS, :], wht_ref[n * H:(n + 1) * H, :],
                        preferred_element_type=jnp.float32)
    o_ref[...] = z


def _pick_seq_tile(num_seq, cap=128):
    if num_seq <= cap:
        return num_seq
    for ts in range(cap, 0, -1):
        if num_seq % ts == 0 and ts % 8 == 0:
            return ts
    return num_seq


def attn_readout_and_head(h_tok, wq, wk, wv, wo, w1, w2, w_head, *,
                          num_rnn, num_heads, seq_tile):
    AN, H = h_tok.shape
    N = num_rnn
    S = AN // N
    V = w_head.shape[0]
    TS = seq_tile
    assert S % TS == 0
    A = TS * N

    # Masks / permutation are identical for every block (local indices) -> host-side once.
    a = np.arange(A)
    same = (a[:, None] // N) == (a[None, :] // N)
    sbias = np.where(same, 0.0, -1e30).astype(np.float32)                  # (A, A)
    perm = np.zeros((A, A), np.float32)                                    # (N*TS, A)
    perm[(a % N) * TS + (a // N), a] = 1.0

    wqkvt = jnp.concatenate([wq.T, wk.T, wv.T], axis=1)                    # (H, 3H)

    kernel = functools.partial(attn_readout_head_kernel,
                               num_heads=num_heads, num_rnn=N)
    out = pl.pallas_call(
        kernel,
        out_shape=jax.ShapeDtypeStruct((S, V), jnp.float32),
        grid_spec=pltpu.PrefetchScalarGridSpec(
            num_scalar_prefetch=0,
            grid=(S // TS,),
            in_specs=[pl.BlockSpec((A, H), lambda s: (s, 0)),
                      pl.BlockSpec((H, 3 * H), lambda s: (0, 0)),
                      pl.BlockSpec((H, H), lambda s: (0, 0)),
                      pl.BlockSpec((H, 4 * H), lambda s: (0, 0)),
                      pl.BlockSpec((4 * H, H), lambda s: (0, 0)),
                      pl.BlockSpec((N * H, V), lambda s: (0, 0)),
                      pl.BlockSpec((A, A), lambda s: (0, 0)),
                      pl.BlockSpec((A, A), lambda s: (0, 0))],
            out_specs=pl.BlockSpec((TS, V), lambda s: (s, 0))),
        compiler_params=pltpu.CompilerParams(dimension_semantics=("parallel",)),
    )(h_tok, wqkvt, wo.T, w1.T, w2.T, w_head.T,
      jnp.asarray(sbias), jnp.asarray(perm))
    return out                                                             # (S, V)


# ----------------------------------------------------------------------------------
# Full AttentionRedFB forward
# ----------------------------------------------------------------------------------
def attention_redfb_forward(x, params, *, num_rnn, num_heads, seq_tile=None):
    B, T, _ = x.shape
    NH = params["w_ih"].shape[0]
    H = NH // num_rnn

    # Hoisted input projections: one well-shaped GEMM each, written time-major so the
    # recurrence kernel needs no transposes; batch padded to a multiple of 8 sublanes.
    BB = 8
    B_pad = ((B + BB - 1) // BB) * BB
    x_pad = jnp.pad(x.astype(jnp.float32), ((0, B_pad - B), (0, 0), (0, 0)))
    hp = lax.Precision.HIGHEST
    pre = jnp.einsum("bti,hi->tbh", x_pad, params["w_ih"], precision=hp)
    pre_sw = jnp.einsum("bti,hi->tbh", x_pad, params["w_ih_sw"], precision=hp)

    h_all = msm_parallel_rnn(pre, pre_sw, params["c_hh"], batch_tile=BB)  # (T, B_pad, NH)

    # torch.chunk(dim=2) + stack(dim=2)  ==  each (t, b) becomes a sequence of N tokens.
    h_tok = h_all[:, :B, :].reshape(T * B * num_rnn, H)                   # (S*N, H)

    S = T * B
    if seq_tile is None:
        seq_tile = _pick_seq_tile(S)
    out = attn_readout_and_head(h_tok, params["wq"], params["wk"], params["wv"],
                                params["wo"], params["w1"], params["w2"],
                                params["w_head"], num_rnn=num_rnn,
                                num_heads=num_heads, seq_tile=seq_tile)   # (S, V), t-major
    return jnp.transpose(out.reshape(T, B, -1), (1, 0, 2))                # (B, T, vocab)


# ----------------------------------------------------------------------------------
# Pure-JAX reference (PyTorch semantics, exact-erf GELU) for validation
# ----------------------------------------------------------------------------------
def reference_forward(x, params, *, num_rnn, num_heads):
    with jax.default_matmul_precision("highest"):
        w_ih, w_hh = params["w_ih"], params["w_hh"]
        B, T, _ = x.shape
        NH = w_ih.shape[0]
        H = NH // num_rnn
        h = jnp.zeros((B, NH), jnp.float32)
        hs = []
        for t in range(T):
            h = jax.nn.relu(x[:, t] @ w_ih.T + h @ w_hh.T)
            hs.append(h)
        h_all = jnp.stack(hs, axis=1)                     # (B, T, NH)
        hseq = h_all.reshape(B * T, num_rnn, H)           # (S, N, H)
        S, N, _ = hseq.shape
        hd = H // num_heads
        q = hseq @ params["wq"].T
        k = hseq @ params["wk"].T
        v = hseq @ params["wv"].T
        split = lambda z: z.reshape(S, N, num_heads, hd).transpose(0, 2, 1, 3)
        qh, kh, vh = split(q), split(k), split(v)
        s = jnp.einsum("shnd,shmd->shnm", qh / np.sqrt(hd), kh)
        p = jax.nn.softmax(s, axis=-1)
        o = jnp.einsum("shnm,shmd->shnd", p, vh)
        o = o.transpose(0, 2, 1, 3).reshape(S, N, H)
        h1 = hseq + o @ params["wo"].T
        f = jax.nn.gelu(h1 @ params["w1"].T, approximate=False)
        h2 = h1 + f @ params["w2"].T
        flat = h2.reshape(B, T, N * H)
        return flat @ params["w_head"].T


if __name__ == "__main__":
    B, T = 2, 8
    input_size, d_model, vocab_size = 8, 32, 16
    num_rnn, num_heads = 4, 4

    key = jax.random.PRNGKey(0)
    kp, kx = jax.random.split(key)
    params = build_params(input_size, d_model, num_rnn, num_heads, vocab_size, kp)
    x = jax.random.normal(kx, (B, T, input_size), jnp.float32)

    fwd = jax.jit(functools.partial(attention_redfb_forward,
                                    num_rnn=num_rnn, num_heads=num_heads))
    out = jax.block_until_ready(fwd(x, params))
    assert out.shape == (B, T, vocab_size)

    ref = reference_forward(x, params, num_rnn=num_rnn, num_heads=num_heads)
    # Only intended deviation from the exact reference is the tanh-approx GELU (~3e-3).
    np.testing.assert_allclose(np.asarray(out), np.asarray(ref), rtol=2e-2, atol=2e-2)
    print("KERNEL_OK")
</pallas_src>

<mosaic_0001>
module attributes {stable_mosaic.version = 11 : i64} {
  func.func @rnn_step_kernel(%arg0: i32, %arg1: i32, %arg2: memref<8x8x128xf32, #tpu.memory_space<vmem>>, %arg3: memref<8x8x128xf32, #tpu.memory_space<vmem>>, %arg4: memref<1x128xf32, #tpu.memory_space<vmem>>, %arg5: memref<8x8x128xf32, #tpu.memory_space<vmem>>, %arg6: memref<8x128xf32, #tpu.memory_space<vmem>>, %arg7: memref<8x128xf32, #tpu.memory_space<vmem>>) attributes {dimension_semantics = [#tpu.dimension_semantics<parallel>, #tpu.dimension_semantics<arbitrary>], iteration_bounds = array<i64: 1, 1>, scalar_prefetch = 0 : i64, scratch_operands = 2 : i64, tpu.core_type = #tpu.core_type<tc>, window_params = [{transform_indices = @transform_0, window_bounds = array<i64: 8, 8, 128>}, {transform_indices = @transform_1, window_bounds = array<i64: 8, 8, 128>}, {pipeline_mode = #tpu.pipeline_mode<synchronous>, transform_indices = @transform_2, window_bounds = array<i64: 1, 128>}, {transform_indices = @transform_3, window_bounds = array<i64: 8, 8, 128>}]} {
    %c0_i32 = arith.constant 0 : i32
    %0 = arith.cmpi eq, %arg1, %c0_i32 : i32
    %1 = arith.extui %0 : i1 to i32
    %c0_i32_0 = arith.constant 0 : i32
    %2 = arith.cmpi ne, %1, %c0_i32_0 : i32
    scf.if %2 {
      %cst_90 = arith.constant 0.000000e+00 : f32
      %144 = vector.broadcast %cst_90 : f32 to vector<8x128xf32>
      %c0_91 = arith.constant 0 : index
      %c0_92 = arith.constant 0 : index
      %145 = vector.load %arg6[%c0_91, %c0_92] : memref<8x128xf32, #tpu.memory_space<vmem>>, vector<8x128xf32>
      tpu.vector_store %arg6[%c0_91, %c0_92], %144 {strides = array<i32>} : memref<8x128xf32, #tpu.memory_space<vmem>>, vector<8x128xf32>,
      %cst_93 = arith.constant 0.000000e+00 : f32
      %146 = vector.broadcast %cst_93 : f32 to vector<8x128xf32>
      %c0_94 = arith.constant 0 : index
      %c0_95 = arith.constant 0 : index
      %147 = vector.load %arg7[%c0_94, %c0_95] : memref<8x128xf32, #tpu.memory_space<vmem>>, vector<8x128xf32>
      tpu.vector_store %arg7[%c0_94, %c0_95], %146 {strides = array<i32>} : memref<8x128xf32, #tpu.memory_space<vmem>>, vector<8x128xf32>,
    } else {
    }
    %c0 = arith.constant 0 : index
    %c0_1 = arith.constant 0 : index
    %3 = vector.load %arg4[%c0, %c0_1] : memref<1x128xf32, #tpu.memory_space<vmem>>, vector<1x128xf32>
    %c0_2 = arith.constant 0 : index
    %c0_3 = arith.constant 0 : index
    %4 = vector.load %arg6[%c0_2, %c0_3] : memref<8x128xf32, #tpu.memory_space<vmem>>, vector<8x128xf32>
    %c0_4 = arith.constant 0 : index
    %c0_5 = arith.constant 0 : index
    %5 = vector.load %arg7[%c0_4, %c0_5] : memref<8x128xf32, #tpu.memory_space<vmem>>, vector<8x128xf32>
    %c0_6 = arith.constant 0 : index
    %c0_7 = arith.constant 0 : index
    %c0_8 = arith.constant 0 : index
    %6 = vector.load %arg2[%c0_6, %c0_7, %c0_8] : memref<8x8x128xf32, #tpu.memory_space<vmem>>, vector<1x8x128xf32>
    %7 = vector.shape_cast %6 : vector<1x8x128xf32> to vector<8x128xf32>
    %8 = vector.broadcast %3 : vector<1x128xf32> to vector<8x128xf32>
    %9 = arith.mulf %8, %5 : vector<8x128xf32>
    %10 = arith.addf %7, %9 : vector<8x128xf32>
    %cst = arith.constant 0.000000e+00 : f32
    %11 = vector.broadcast %cst : f32 to vector<8x128xf32>
    %12 = arith.maximumf %10, %11 : vector<8x128xf32>
    %c0_9 = arith.constant 0 : index
    %c0_10 = arith.constant 0 : index
    %c0_11 = arith.constant 0 : index
    %13 = vector.load %arg3[%c0_9, %c0_10, %c0_11] : memref<8x8x128xf32, #tpu.memory_space<vmem>>, vector<1x8x128xf32>
    %14 = vector.shape_cast %13 : vector<1x8x128xf32> to vector<8x128xf32>
    %15 = vector.broadcast %3 : vector<1x128xf32> to vector<8x128xf32>
    %16 = arith.mulf %15, %4 : vector<8x128xf32>
    %17 = arith.addf %14, %16 : vector<8x128xf32>
    %cst_12 = arith.constant 0.000000e+00 : f32
    %18 = vector.broadcast %cst_12 : f32 to vector<8x128xf32>
    %19 = arith.maximumf %17, %18 : vector<8x128xf32>
    %c0_13 = arith.constant 0 : index
    %c0_14 = arith.constant 0 : index
    %c0_15 = arith.constant 0 : index
    %20 = vector.load %arg5[%c0_13, %c0_14, %c0_15] : memref<8x8x128xf32, #tpu.memory_space<vmem>>, vector<1x8x128xf32>
    %21 = vector.shape_cast %20 : vector<1x8x128xf32> to vector<8x128xf32>
    %22 = vector.shape_cast %12 : vector<8x128xf32> to vector<1x8x128xf32>
    tpu.vector_store %arg5[%c0_13, %c0_14, %c0_15], %22 {strides = array<i32>} : memref<8x8x128xf32, #tpu.memory_space<vmem>>, vector<1x8x128xf32>,
    %c1 = arith.constant 1 : index
    %c0_16 = arith.constant 0 : index
    %c0_17 = arith.constant 0 : index
    %23 = vector.load %arg2[%c1, %c0_16, %c0_17] : memref<8x8x128xf32, #tpu.memory_space<vmem>>, vector<1x8x128xf32>
    %24 = vector.shape_cast %23 : vector<1x8x128xf32> to vector<8x128xf32>
    %25 = vector.broadcast %3 : vector<1x128xf32> to vector<8x128xf32>
    %26 = arith.mulf %25, %19 : vector<8x128xf32>
    %27 = arith.addf %24, %26 : vector<8x128xf32>
    %cst_18 = arith.constant 0.000000e+00 : f32
    %28 = vector.broadcast %cst_18 : f32 to vector<8x128xf32>
    %29 = arith.maximumf %27, %28 : vector<8x128xf32>
    %c1_19 = arith.constant 1 : index
    %c0_20 = arith.constant 0 : index
    %c0_21 = arith.constant 0 : index
    %30 = vector.load %arg3[%c1_19, %c0_20, %c0_21] : memref<8x8x128xf32, #tpu.memory_space<vmem>>, vector<1x8x128xf32>
    %31 = vector.shape_cast %30 : vector<1x8x128xf32> to vector<8x128xf32>
    %32 = vector.broadcast %3 : vector<1x128xf32> to vector<8x128xf32>
    %33 = arith.mulf %32, %12 : vector<8x128xf32>
    %34 = arith.addf %31, %33 : vector<8x128xf32>
    %cst_22 = arith.constant 0.000000e+00 : f32
    %35 = vector.broadcast %cst_22 : f32 to vector<8x128xf32>
    %36 = arith.maximumf %34, %35 : vector<8x128xf32>
    %c1_23 = arith.constant 1 : index
    %c0_24 = arith.constant 0 : index
    %c0_25 = arith.constant 0 : index
    %37 = vector.load %arg5[%c1_23, %c0_24, %c0_25] : memref<8x8x128xf32, #tpu.memory_space<vmem>>, vector<1x8x128xf32>
    %38 = vector.shape_cast %37 : vector<1x8x128xf32> to vector<8x128xf32>
    %39 = vector.shape_cast %29 : vector<8x128xf32> to vector<1x8x128xf32>
    tpu.vector_store %arg5[%c1_23, %c0_24, %c0_25], %39 {strides = array<i32>} : memref<8x8x128xf32, #tpu.memory_space<vmem>>, vector<1x8x128xf32>,
    %c2 = arith.constant 2 : index
    %c0_26 = arith.constant 0 : index
    %c0_27 = arith.constant 0 : index
    %40 = vector.load %arg2[%c2, %c0_26, %c0_27] : memref<8x8x128xf32, #tpu.memory_space<vmem>>, vector<1x8x128xf32>
    %41 = vector.shape_cast %40 : vector<1x8x128xf32> to vector<8x128xf32>
    %42 = vector.broadcast %3 : vector<1x128xf32> to vector<8x128xf32>
    %43 = arith.mulf %42, %36 : vector<8x128xf32>
    %44 = arith.addf %41, %43 : vector<8x128xf32>
    %cst_28 = arith.constant 0.000000e+00 : f32
    %45 = vector.broadcast %cst_28 : f32 to vector<8x128xf32>
    %46 = arith.maximumf %44, %45 : vector<8x128xf32>
    %c2_29 = arith.constant 2 : index
    %c0_30 = arith.constant 0 : index
    %c0_31 = arith.constant 0 : index
    %47 = vector.load %arg3[%c2_29, %c0_30, %c0_31] : memref<8x8x128xf32, #tpu.memory_space<vmem>>, vector<1x8x128xf32>
    %48 = vector.shape_cast %47 : vector<1x8x128xf32> to vector<8x128xf32>
    %49 = vector.broadcast %3 : vector<1x128xf32> to vector<8x128xf32>
    %50 = arith.mulf %49, %29 : vector<8x128xf32>
    %51 = arith.addf %48, %50 : vector<8x128xf32>
    %cst_32 = arith.constant 0.000000e+00 : f32
    %52 = vector.broadcast %cst_32 : f32 to vector<8x128xf32>
    %53 = arith.maximumf %51, %52 : vector<8x128xf32>
    %c2_33 = arith.constant 2 : index
    %c0_34 = arith.constant 0 : index
    %c0_35 = arith.constant 0 : index
    %54 = vector.load %arg5[%c2_33, %c0_34, %c0_35] : memref<8x8x128xf32, #tpu.memory_space<vmem>>, vector<1x8x128xf32>
    %55 = vector.shape_cast %54 : vector<1x8x128xf32> to vector<8x128xf32>
    %56 = vector.shape_cast %46 : vector<8x128xf32> to vector<1x8x128xf32>
    tpu.vector_store %arg5[%c2_33, %c0_34, %c0_35], %56 {strides = array<i32>} : memref<8x8x128xf32, #tpu.memory_space<vmem>>, vector<1x8x128xf32>,
    %c3 = arith.constant 3 : index
    %c0_36 = arith.constant 0 : index
    %c0_37 = arith.constant 0 : index
    %57 = vector.load %arg2[%c3, %c0_36, %c0_37] : memref<8x8x128xf32, #tpu.memory_space<vmem>>, vector<1x8x128xf32>
    %58 = vector.shape_cast %57 : vector<1x8x128xf32> to vector<8x128xf32>
    %59 = vector.broadcast %3 : vector<1x128xf32> to vector<8x128xf32>
    %60 = arith.mulf %59, %53 : vector<8x128xf32>
    %61 = arith.addf %58, %60 : vector<8x128xf32>
    %cst_38 = arith.constant 0.000000e+00 : f32
    %62 = vector.broadcast %cst_38 : f32 to vector<8x128xf32>
    %63 = arith.maximumf %61, %62 : vector<8x128xf32>
    %c3_39 = arith.constant 3 : index
    %c0_40 = arith.constant 0 : index
    %c0_41 = arith.constant 0 : index
    %64 = vector.load %arg3[%c3_39, %c0_40, %c0_41] : memref<8x8x128xf32, #tpu.memory_space<vmem>>, vector<1x8x128xf32>
    %65 = vector.shape_cast %64 : vector<1x8x128xf32> to vector<8x128xf32>
    %66 = vector.broadcast %3 : vector<1x128xf32> to vector<8x128xf32>
    %67 = arith.mulf %66, %46 : vector<8x128xf32>
    %68 = arith.addf %65, %67 : vector<8x128xf32>
    %cst_42 = arith.constant 0.000000e+00 : f32
    %69 = vector.broadcast %cst_42 : f32 to vector<8x128xf32>
    %70 = arith.maximumf %68, %69 : vector<8x128xf32>
    %c3_43 = arith.constant 3 : index
    %c0_44 = arith.constant 0 : index
    %c0_45 = arith.constant 0 : index
    %71 = vector.load %arg5[%c3_43, %c0_44, %c0_45] : memref<8x8x128xf32, #tpu.memory_space<vmem>>, vector<1x8x128xf32>
    %72 = vector.shape_cast %71 : vector<1x8x128xf32> to vector<8x128xf32>
    %73 = vector.shape_cast %63 : vector<8x128xf32> to vector<1x8x128xf32>
    tpu.vector_store %arg5[%c3_43, %c0_44, %c0_45], %73 {strides = array<i32>} : memref<8x8x128xf32, #tpu.memory_space<vmem>>, vector<1x8x128xf32>,
    %c4 = arith.constant 4 : index
    %c0_46 = arith.constant 0 : index
    %c0_47 = arith.constant 0 : index
    %74 = vector.load %arg2[%c4, %c0_46, %c0_47] : memref<8x8x128xf32, #tpu.memory_space<vmem>>, vector<1x8x128xf32>
    %75 = vector.shape_cast %74 : vector<1x8x128xf32> to vector<8x128xf32>
    %76 = vector.broadcast %3 : vector<1x128xf32> to vector<8x128xf32>
    %77 = arith.mulf %76, %70 : vector<8x128xf32>
    %78 = arith.addf %75, %77 : vector<8x128xf32>
    %cst_48 = arith.constant 0.000000e+00 : f32
    %79 = vector.broadcast %cst_48 : f32 to vector<8x128xf32>
    %80 = arith.maximumf %78, %79 : vector<8x128xf32>
    %c4_49 = arith.constant 4 : index
    %c0_50 = arith.constant 0 : index
    %c0_51 = arith.constant 0 : index
    %81 = vector.load %arg3[%c4_49, %c0_50, %c0_51] : memref<8x8x128xf32, #tpu.memory_space<vmem>>, vector<1x8x128xf32>
    %82 = vector.shape_cast %81 : vector<1x8x128xf32> to vector<8x128xf32>
    %83 = vector.broadcast %3 : vector<1x128xf32> to vector<8x128xf32>
    %84 = arith.mulf %83, %63 : vector<8x128xf32>
    %85 = arith.addf %82, %84 : vector<8x128xf32>
    %cst_52 = arith.constant 0.000000e+00 : f32
    %86 = vector.broadcast %cst_52 : f32 to vector<8x128xf32>
    %87 = arith.maximumf %85, %86 : vector<8x128xf32>
    %c4_53 = arith.constant 4 : index
    %c0_54 = arith.constant 0 : index
    %c0_55 = arith.constant 0 : index
    %88 = vector.load %arg5[%c4_53, %c0_54, %c0_55] : memref<8x8x128xf32, #tpu.memory_space<vmem>>, vector<1x8x128xf32>
    %89 = vector.shape_cast %88 : vector<1x8x128xf32> to vector<8x128xf32>
    %90 = vector.shape_cast %80 : vector<8x128xf32> to vector<1x8x128xf32>
    tpu.vector_store %arg5[%c4_53, %c0_54, %c0_55], %90 {strides = array<i32>} : memref<8x8x128xf32, #tpu.memory_space<vmem>>, vector<1x8x128xf32>,
    %c5 = arith.constant 5 : index
    %c0_56 = arith.constant 0 : index
    %c0_57 = arith.constant 0 : index
    %91 = vector.load %arg2[%c5, %c0_56, %c0_57] : memref<8x8x128xf32, #tpu.memory_space<vmem>>, vector<1x8x128xf32>
    %92 = vector.shape_cast %91 : vector<1x8x128xf32> to vector<8x128xf32>
    %93 = vector.broadcast %3 : vector<1x128xf32> to vector<8x128xf32>
    %94 = arith.mulf %93, %87 : vector<8x128xf32>
    %95 = arith.addf %92, %94 : vector<8x128xf32>
    %cst_58 = arith.constant 0.000000e+00 : f32
    %96 = vector.broadcast %cst_58 : f32 to vector<8x128xf32>
    %97 = arith.maximumf %95, %96 : vector<8x128xf32>
    %c5_59 = arith.constant 5 : index
    %c0_60 = arith.constant 0 : index
    %c0_61 = arith.constant 0 : index
    %98 = vector.load %arg3[%c5_59, %c0_60, %c0_61] : memref<8x8x128xf32, #tpu.memory_space<vmem>>, vector<1x8x128xf32>
    %99 = vector.shape_cast %98 : vector<1x8x128xf32> to vector<8x128xf32>
    %100 = vector.broadcast %3 : vector<1x128xf32> to vector<8x128xf32>
    %101 = arith.mulf %100, %80 : vector<8x128xf32>
    %102 = arith.addf %99, %101 : vector<8x128xf32>
    %cst_62 = arith.constant 0.000000e+00 : f32
    %103 = vector.broadcast %cst_62 : f32 to vector<8x128xf32>
    %104 = arith.maximumf %102, %103 : vector<8x128xf32>
    %c5_63 = arith.constant 5 : index
    %c0_64 = arith.constant 0 : index
    %c0_65 = arith.constant 0 : index
    %105 = vector.load %arg5[%c5_63, %c0_64, %c0_65] : memref<8x8x128xf32, #tpu.memory_space<vmem>>, vector<1x8x128xf32>
    %106 = vector.shape_cast %105 : vector<1x8x128xf32> to vector<8x128xf32>
    %107 = vector.shape_cast %97 : vector<8x128xf32> to vector<1x8x128xf32>
    tpu.vector_store %arg5[%c5_63, %c0_64, %c0_65], %107 {strides = array<i32>} : memref<8x8x128xf32, #tpu.memory_space<vmem>>, vector<1x8x128xf32>,
    %c6 = arith.constant 6 : index
    %c0_66 = arith.constant 0 : index
    %c0_67 = arith.constant 0 : index
    %108 = vector.load %arg2[%c6, %c0_66, %c0_67] : memref<8x8x128xf32, #tpu.memory_space<vmem>>, vector<1x8x128xf32>
    %109 = vector.shape_cast %108 : vector<1x8x128xf32> to vector<8x128xf32>
    %110 = vector.broadcast %3 : vector<1x128xf32> to vector<8x128xf32>
    %111 = arith.mulf %110, %104 : vector<8x128xf32>
    %112 = arith.addf %109, %111 : vector<8x128xf32>
    %cst_68 = arith.constant 0.000000e+00 : f32
    %113 = vector.broadcast %cst_68 : f32 to vector<8x128xf32>
    %114 = arith.maximumf %112, %113 : vector<8x128xf32>
    %c6_69 = arith.constant 6 : index
    %c0_70 = arith.constant 0 : index
    %c0_71 = arith.constant 0 : index
    %115 = vector.load %arg3[%c6_69, %c0_70, %c0_71] : memref<8x8x128xf32, #tpu.memory_space<vmem>>, vector<1x8x128xf32>
    %116 = vector.shape_cast %115 : vector<1x8x128xf32> to vector<8x128xf32>
    %117 = vector.broadcast %3 : vector<1x128xf32> to vector<8x128xf32>
    %118 = arith.mulf %117, %97 : vector<8x128xf32>
    %119 = arith.addf %116, %118 : vector<8x128xf32>
    %cst_72 = arith.constant 0.000000e+00 : f32
    %120 = vector.broadcast %cst_72 : f32 to vector<8x128xf32>
    %121 = arith.maximumf %119, %120 : vector<8x128xf32>
    %c6_73 = arith.constant 6 : index
    %c0_74 = arith.constant 0 : index
    %c0_75 = arith.constant 0 : index
    %122 = vector.load %arg5[%c6_73, %c0_74, %c0_75] : memref<8x8x128xf32, #tpu.memory_space<vmem>>, vector<1x8x128xf32>
    %123 = vector.shape_cast %122 : vector<1x8x128xf32> to vector<8x128xf32>
    %124 = vector.shape_cast %114 : vector<8x128xf32> to vector<1x8x128xf32>
    tpu.vector_store %arg5[%c6_73, %c0_74, %c0_75], %124 {strides = array<i32>} : memref<8x8x128xf32, #tpu.memory_space<vmem>>, vector<1x8x128xf32>,
    %c7 = arith.constant 7 : index
    %c0_76 = arith.constant 0 : index
    %c0_77 = arith.constant 0 : index
    %125 = vector.load %arg2[%c7, %c0_76, %c0_77] : memref<8x8x128xf32, #tpu.memory_space<vmem>>, vector<1x8x128xf32>
    %126 = vector.shape_cast %125 : vector<1x8x128xf32> to vector<8x128xf32>
    %127 = vector.broadcast %3 : vector<1x128xf32> to vector<8x128xf32>
    %128 = arith.mulf %127, %121 : vector<8x128xf32>
    %129 = arith.addf %126, %128 : vector<8x128xf32>
    %cst_78 = arith.constant 0.000000e+00 : f32
    %130 = vector.broadcast %cst_78 : f32 to vector<8x128xf32>
    %131 = arith.maximumf %129, %130 : vector<8x128xf32>
    %c7_79 = arith.constant 7 : index
    %c0_80 = arith.constant 0 : index
    %c0_81 = arith.constant 0 : index
    %132 = vector.load %arg3[%c7_79, %c0_80, %c0_81] : memref<8x8x128xf32, #tpu.memory_space<vmem>>, vector<1x8x128xf32>
    %133 = vector.shape_cast %132 : vector<1x8x128xf32> to vector<8x128xf32>
    %134 = vector.broadcast %3 : vector<1x128xf32> to vector<8x128xf32>
    %135 = arith.mulf %134, %114 : vector<8x128xf32>
    %136 = arith.addf %133, %135 : vector<8x128xf32>
    %cst_82 = arith.constant 0.000000e+00 : f32
    %137 = vector.broadcast %cst_82 : f32 to vector<8x128xf32>
    %138 = arith.maximumf %136, %137 : vector<8x128xf32>
    %c7_83 = arith.constant 7 : index
    %c0_84 = arith.constant 0 : index
    %c0_85 = arith.constant 0 : index
    %139 = vector.load %arg5[%c7_83, %c0_84, %c0_85] : memref<8x8x128xf32, #tpu.memory_space<vmem>>, vector<1x8x128xf32>
    %140 = vector.shape_cast %139 : vector<1x8x128xf32> to vector<8x128xf32>
    %141 = vector.shape_cast %131 : vector<8x128xf32> to vector<1x8x128xf32>
    tpu.vector_store %arg5[%c7_83, %c0_84, %c0_85], %141 {strides = array<i32>} : memref<8x8x128xf32, #tpu.memory_space<vmem>>, vector<1x8x128xf32>,
    %c0_86 = arith.constant 0 : index
    %c0_87 = arith.constant 0 : index
    %142 = vector.load %arg6[%c0_86, %c0_87] : memref<8x128xf32, #tpu.memory_space<vmem>>, vector<8x128xf32>
    tpu.vector_store %arg6[%c0_86, %c0_87], %131 {strides = array<i32>} : memref<8x128xf32, #tpu.memory_space<vmem>>, vector<8x128xf32>,
    %c0_88 = arith.constant 0 : index
    %c0_89 = arith.constant 0 : index
    %143 = vector.load %arg7[%c0_88, %c0_89] : memref<8x128xf32, #tpu.memory_space<vmem>>, vector<8x128xf32>
    tpu.vector_store %arg7[%c0_88, %c0_89], %138 {strides = array<i32>} : memref<8x128xf32, #tpu.memory_space<vmem>>, vector<8x128xf32>,
    return
  }
  func.func @transform_0(%arg0: i32, %arg1: i32) -> (i32, i32, i32) {
    %c0_i32 = arith.constant 0 : i32
    %c0_i32_0 = arith.constant 0 : i32
    return %arg1, %arg0, %c0_i32 : i32, i32, i32
  }
  func.func @transform_1(%arg0: i32, %arg1: i32) -> (i32, i32, i32) {
    %c0_i32 = arith.constant 0 : i32
    %c0_i32_0 = arith.constant 0 : i32
    return %arg1, %arg0, %c0_i32 : i32, i32, i32
  }
  func.func @transform_2(%arg0: i32, %arg1: i32) -> (i32, i32) {
    %c0_i32 = arith.constant 0 : i32
    %c0_i32_0 = arith.constant 0 : i32
    %c0_i32_1 = arith.constant 0 : i32
    return %c0_i32, %c0_i32_0 : i32, i32
  }
  func.func @transform_3(%arg0: i32, %arg1: i32) -> (i32, i32, i32) {
    %c0_i32 = arith.constant 0 : i32
    %c0_i32_0 = arith.constant 0 : i32
    return %arg1, %arg0, %c0_i32 : i32, i32, i32
  }
}

module attributes {stable_mosaic.version = 11 : i64} {
  func.func @attn_readout_head_kernel(%arg0: i32, %arg1: memref<64x32xf32, #tpu.memory_space<vmem>>, %arg2: memref<32x96xf32, #tpu.memory_space<vmem>>, %arg3: memref<32x32xf32, #tpu.memory_space<vmem>>, %arg4: memref<32x128xf32, #tpu.memory_space<vmem>>, %arg5: memref<128x32xf32, #tpu.memory_space<vmem>>, %arg6: memref<128x16xf32, #tpu.memory_space<vmem>>, %arg7: memref<64x64xf32, #tpu.memory_space<vmem>>, %arg8: memref<64x64xf32, #tpu.memory_space<vmem>>, %arg9: memref<16x16xf32, #tpu.memory_space<vmem>>) attributes {dimension_semantics = [#tpu.dimension_semantics<parallel>], iteration_bounds = array<i64: 1>, scalar_prefetch = 0 : i64, scratch_operands = 0 : i64, tpu.core_type = #tpu.core_type<tc>, window_params = [{transform_indices = @transform_0, window_bounds = array<i64: 64, 32>}, {pipeline_mode = #tpu.pipeline_mode<synchronous>, transform_indices = @transform_1, window_bounds = array<i64: 32, 96>}, {pipeline_mode = #tpu.pipeline_mode<synchronous>, transform_indices = @transform_2, window_bounds = array<i64: 32, 32>}, {pipeline_mode = #tpu.pipeline_mode<synchronous>, transform_indices = @transform_3, window_bounds = array<i64: 32, 128>}, {pipeline_mode = #tpu.pipeline_mode<synchronous>, transform_indices = @transform_4, window_bounds = array<i64: 128, 32>}, {pipeline_mode = #tpu.pipeline_mode<synchronous>, transform_indices = @transform_5, window_bounds = array<i64: 128, 16>}, {pipeline_mode = #tpu.pipeline_mode<synchronous>, transform_indices = @transform_6, window_bounds = array<i64: 64, 64>}, {pipeline_mode = #tpu.pipeline_mode<synchronous>, transform_indices = @transform_7, window_bounds = array<i64: 64, 64>}, {transform_indices = @transform_8, window_bounds = array<i64: 16, 16>}]} {
    %c0 = arith.constant 0 : index
    %c0_0 = arith.constant 0 : index
    %0 = vector.load %arg1[%c0, %c0_0] : memref<64x32xf32, #tpu.memory_space<vmem>>, vector<64x32xf32>
    %c0_1 = arith.constant 0 : index
    %c0_2 = arith.constant 0 : index
    %1 = vector.load %arg2[%c0_1, %c0_2] : memref<32x96xf32, #tpu.memory_space<vmem>>, vector<32x96xf32>
    %cst = arith.constant dense<0.000000e+00> : vector<64x96xf32>
    %2 = tpu.matmul %0, %1, %cst {dimension_numbers = #tpu.dot_dimension_numbers<[1], [0], [0], [1], [0, 0, 1, 1], [], []>} : vector<64x32xf32>, vector<32x96xf32>, vector<64x96xf32> -> vector<64x96xf32>
    %c0_3 = arith.constant 0 : index
    %c0_4 = arith.constant 0 : index
    %3 = vector.load %arg7[%c0_3, %c0_4] : memref<64x64xf32, #tpu.memory_space<vmem>>, vector<64x64xf32>
    %4 = vector.extract_strided_slice %2 {offsets = [0, 0], sizes = [64, 8], strides = [1, 1]} : vector<64x96xf32> to vector<64x8xf32>
    %cst_5 = arith.constant 0.353553385 : f32
    %5 = vector.broadcast %cst_5 : f32 to vector<64x8xf32>
    %6 = arith.mulf %4, %5 : vector<64x8xf32>
    %7 = vector.extract_strided_slice %2 {offsets = [0, 32], sizes = [64, 8], strides = [1, 1]} : vector<64x96xf32> to vector<64x8xf32>
    %8 = vector.extract_strided_slice %2 {offsets = [0, 64], sizes = [64, 8], strides = [1, 1]} : vector<64x96xf32> to vector<64x8xf32>
    %cst_6 = arith.constant dense<0.000000e+00> : vector<64x64xf32>
    %9 = tpu.matmul %6, %7, %cst_6 {dimension_numbers = #tpu.dot_dimension_numbers<[1], [1], [0], [0], [0, 0, 1, 0], [], []>} : vector<64x8xf32>, vector<64x8xf32>, vector<64x64xf32> -> vector<64x64xf32>
    %10 = arith.addf %9, %3 : vector<64x64xf32>
    %cst_7 = arith.constant dense<0xFF800000> : vector<64xf32>
    %11 = vector.multi_reduction <maximumf>, %10, %cst_7 [1] : vector<64x64xf32> to vector<64xf32>
    %12 = vector.shape_cast %11 : vector<64xf32> to vector<64x1xf32>
    %13 = vector.broadcast %12 : vector<64x1xf32> to vector<64x64xf32>
    %14 = arith.subf %10, %13 : vector<64x64xf32>
    %15 = math.exp %14 : vector<64x64xf32>
    %cst_8 = arith.constant dense<0.000000e+00> : vector<64xf32>
    %16 = vector.multi_reduction <add>, %15, %cst_8 [1] : vector<64x64xf32> to vector<64xf32>
    %17 = vector.shape_cast %16 : vector<64xf32> to vector<64x1xf32>
    %18 = tpu.reciprocal %17 {approx = true} : vector<64x1xf32> -> vector<64x1xf32>
    %19 = vector.broadcast %18 : vector<64x1xf32> to vector<64x64xf32>
    %20 = arith.mulf %15, %19 : vector<64x64xf32>
    %cst_9 = arith.constant dense<0.000000e+00> : vector<64x8xf32>
    %21 = tpu.matmul %20, %8, %cst_9 {dimension_numbers = #tpu.dot_dimension_numbers<[1], [0], [0], [1], [0, 0, 1, 1], [], []>} : vector<64x64xf32>, vector<64x8xf32>, vector<64x8xf32> -> vector<64x8xf32>
    %22 = vector.extract_strided_slice %2 {offsets = [0, 8], sizes = [64, 8], strides = [1, 1]} : vector<64x96xf32> to vector<64x8xf32>
    %cst_10 = arith.constant 0.353553385 : f32
    %23 = vector.broadcast %cst_10 : f32 to vector<64x8xf32>
    %24 = arith.mulf %22, %23 : vector<64x8xf32>
    %25 = vector.extract_strided_slice %2 {offsets = [0, 40], sizes = [64, 8], strides = [1, 1]} : vector<64x96xf32> to vector<64x8xf32>
    %26 = vector.extract_strided_slice %2 {offsets = [0, 72], sizes = [64, 8], strides = [1, 1]} : vector<64x96xf32> to vector<64x8xf32>
    %cst_11 = arith.constant dense<0.000000e+00> : vector<64x64xf32>
    %27 = tpu.matmul %24, %25, %cst_11 {dimension_numbers = #tpu.dot_dimension_numbers<[1], [1], [0], [0], [0, 0, 1, 0], [], []>} : vector<64x8xf32>, vector<64x8xf32>, vector<64x64xf32> -> vector<64x64xf32>
    %28 = arith.addf %27, %3 : vector<64x64xf32>
    %cst_12 = arith.constant dense<0xFF800000> : vector<64xf32>
    %29 = vector.multi_reduction <maximumf>, %28, %cst_12 [1] : vector<64x64xf32> to vector<64xf32>
    %30 = vector.shape_cast %29 : vector<64xf32> to vector<64x1xf32>
    %31 = vector.broadcast %30 : vector<64x1xf32> to vector<64x64xf32>
    %32 = arith.subf %28, %31 : vector<64x64xf32>
    %33 = math.exp %32 : vector<64x64xf32>
    %cst_13 = arith.constant dense<0.000000e+00> : vector<64xf32>
    %34 = vector.multi_reduction <add>, %33, %cst_13 [1] : vector<64x64xf32> to vector<64xf32>
    %35 = vector.shape_cast %34 : vector<64xf32> to vector<64x1xf32>
    %36 = tpu.reciprocal %35 {approx = true} : vector<64x1xf32> -> vector<64x1xf32>
    %37 = vector.broadcast %36 : vector<64x1xf32> to vector<64x64xf32>
    %38 = arith.mulf %33, %37 : vector<64x64xf32>
    %cst_14 = arith.constant dense<0.000000e+00> : vector<64x8xf32>
    %39 = tpu.matmul %38, %26, %cst_14 {dimension_numbers = #tpu.dot_dimension_numbers<[1], [0], [0], [1], [0, 0, 1, 1], [], []>} : vector<64x64xf32>, vector<64x8xf32>, vector<64x8xf32> -> vector<64x8xf32>
    %40 = vector.extract_strided_slice %2 {offsets = [0, 16], sizes = [64, 8], strides = [1, 1]} : vector<64x96xf32> to vector<64x8xf32>
    %cst_15 = arith.constant 0.353553385 : f32
    %41 = vector.broadcast %cst_15 : f32 to vector<64x8xf32>
    %42 = arith.mulf %40, %41 : vector<64x8xf32>
    %43 = vector.extract_strided_slice %2 {offsets = [0, 48], sizes = [64, 8], strides = [1, 1]} : vector<64x96xf32> to vector<64x8xf32>
    %44 = vector.extract_strided_slice %2 {offsets = [0, 80], sizes = [64, 8], strides = [1, 1]} : vector<64x96xf32> to vector<64x8xf32>
    %cst_16 = arith.constant dense<0.000000e+00> : vector<64x64xf32>
    %45 = tpu.matmul %42, %43, %cst_16 {dimension_numbers = #tpu.dot_dimension_numbers<[1], [1], [0], [0], [0, 0, 1, 0], [], []>} : vector<64x8xf32>, vector<64x8xf32>, vector<64x64xf32> -> vector<64x64xf32>
    %46 = arith.addf %45, %3 : vector<64x64xf32>
    %cst_17 = arith.constant dense<0xFF800000> : vector<64xf32>
    %47 = vector.multi_reduction <maximumf>, %46, %cst_17 [1] : vector<64x64xf32> to vector<64xf32>
    %48 = vector.shape_cast %47 : vector<64xf32> to vector<64x1xf32>
    %49 = vector.broadcast %48 : vector<64x1xf32> to vector<64x64xf32>
    %50 = arith.subf %46, %49 : vector<64x64xf32>
    %51 = math.exp %50 : vector<64x64xf32>
    %cst_18 = arith.constant dense<0.000000e+00> : vector<64xf32>
    %52 = vector.multi_reduction <add>, %51, %cst_18 [1] : vector<64x64xf32> to vector<64xf32>
    %53 = vector.shape_cast %52 : vector<64xf32> to vector<64x1xf32>
    %54 = tpu.reciprocal %53 {approx = true} : vector<64x1xf32> -> vector<64x1xf32>
    %55 = vector.broadcast %54 : vector<64x1xf32> to vector<64x64xf32>
    %56 = arith.mulf %51, %55 : vector<64x64xf32>
    %cst_19 = arith.constant dense<0.000000e+00> : vector<64x8xf32>
    %57 = tpu.matmul %56, %44, %cst_19 {dimension_numbers = #tpu.dot_dimension_numbers<[1], [0], [0], [1], [0, 0, 1, 1], [], []>} : vector<64x64xf32>, vector<64x8xf32>, vector<64x8xf32> -> vector<64x8xf32>
    %58 = vector.extract_strided_slice %2 {offsets = [0, 24], sizes = [64, 8], strides = [1, 1]} : vector<64x96xf32> to vector<64x8xf32>
    %cst_20 = arith.constant 0.353553385 : f32
    %59 = vector.broadcast %cst_20 : f32 to vector<64x8xf32>
    %60 = arith.mulf %58, %59 : vector<64x8xf32>
    %61 = vector.extract_strided_slice %2 {offsets = [0, 56], sizes = [64, 8], strides = [1, 1]} : vector<64x96xf32> to vector<64x8xf32>
    %62 = vector.extract_strided_slice %2 {offsets = [0, 88], sizes = [64, 8], strides = [1, 1]} : vector<64x96xf32> to vector<64x8xf32>
    %cst_21 = arith.constant dense<0.000000e+00> : vector<64x64xf32>
    %63 = tpu.matmul %60, %61, %cst_21 {dimension_numbers = #tpu.dot_dimension_numbers<[1], [1], [0], [0], [0, 0, 1, 0], [], []>} : vector<64x8xf32>, vector<64x8xf32>, vector<64x64xf32> -> vector<64x64xf32>
    %64 = arith.addf %63, %3 : vector<64x64xf32>
    %cst_22 = arith.constant dense<0xFF800000> : vector<64xf32>
    %65 = vector.multi_reduction <maximumf>, %64, %cst_22 [1] : vector<64x64xf32> to vector<64xf32>
    %66 = vector.shape_cast %65 : vector<64xf32> to vector<64x1xf32>
    %67 = vector.broadcast %66 : vector<64x1xf32> to vector<64x64xf32>
    %68 = arith.subf %64, %67 : vector<64x64xf32>
    %69 = math.exp %68 : vector<64x64xf32>
    %cst_23 = arith.constant dense<0.000000e+00> : vector<64xf32>
    %70 = vector.multi_reduction <add>, %69, %cst_23 [1] : vector<64x64xf32> to vector<64xf32>
    %71 = vector.shape_cast %70 : vector<64xf32> to vector<64x1xf32>
    %72 = tpu.reciprocal %71 {approx = true} : vector<64x1xf32> -> vector<64x1xf32>
    %73 = vector.broadcast %72 : vector<64x1xf32> to vector<64x64xf32>
    %74 = arith.mulf %69, %73 : vector<64x64xf32>
    %cst_24 = arith.constant dense<0.000000e+00> : vector<64x8xf32>
    %75 = tpu.matmul %74, %62, %cst_24 {dimension_numbers = #tpu.dot_dimension_numbers<[1], [0], [0], [1], [0, 0, 1, 1], [], []>} : vector<64x64xf32>, vector<64x8xf32>, vector<64x8xf32> -> vector<64x8xf32>
    %76 = tpu.concatenate %21, %39, %57, %75 in 1 : vector<64x8xf32>, vector<64x8xf32>, vector<64x8xf32>, vector<64x8xf32> -> vector<64x32xf32>
    %c0_25 = arith.constant 0 : index
    %c0_26 = arith.constant 0 : index
    %77 = vector.load %arg3[%c0_25, %c0_26] : memref<32x32xf32, #tpu.memory_space<vmem>>, vector<32x32xf32>
    %cst_27 = arith.constant dense<0.000000e+00> : vector<64x32xf32>
    %78 = tpu.matmul %76, %77, %cst_27 {dimension_numbers = #tpu.dot_dimension_numbers<[1], [0], [0], [1], [0, 0, 1, 1], [], []>} : vector<64x32xf32>, vector<32x32xf32>, vector<64x32xf32> -> vector<64x32xf32>
    %79 = arith.addf %0, %78 : vector<64x32xf32>
    %c0_28 = arith.constant 0 : index
    %c0_29 = arith.constant 0 : index
    %80 = vector.load %arg4[%c0_28, %c0_29] : memref<32x128xf32, #tpu.memory_space<vmem>>, vector<32x128xf32>
    %cst_30 = arith.constant dense<0.000000e+00> : vector<64x128xf32>
    %81 = tpu.matmul %79, %80, %cst_30 {dimension_numbers = #tpu.dot_dimension_numbers<[1], [0], [0], [1], [0, 0, 1, 1], [], []>} : vector<64x32xf32>, vector<32x128xf32>, vector<64x128xf32> -> vector<64x128xf32>
    %cst_31 = arith.constant 5.000000e-01 : f32
    %82 = vector.broadcast %cst_31 : f32 to vector<64x128xf32>
    %83 = arith.mulf %82, %81 : vector<64x128xf32>
    %cst_32 = arith.constant 4.471500e-02 : f32
    %84 = vector.broadcast %cst_32 : f32 to vector<64x128xf32>
    %85 = arith.mulf %84, %81 : vector<64x128xf32>
    %86 = arith.mulf %85, %81 : vector<64x128xf32>
    %87 = arith.mulf %86, %81 : vector<64x128xf32>
    %88 = arith.addf %81, %87 : vector<64x128xf32>
    %cst_33 = arith.constant 0.797884583 : f32
    %89 = vector.broadcast %cst_33 : f32 to vector<64x128xf32>
    %90 = arith.mulf %89, %88 : vector<64x128xf32>
    %91 = math.tanh %90 : vector<64x128xf32>
    %cst_34 = arith.constant 1.000000e+00 : f32
    %92 = vector.broadcast %cst_34 : f32 to vector<64x128xf32>
    %93 = arith.addf %92, %91 : vector<64x128xf32>
    %94 = arith.mulf %83, %93 : vector<64x128xf32>
    %c0_35 = arith.constant 0 : index
    %c0_36 = arith.constant 0 : index
    %95 = vector.load %arg5[%c0_35, %c0_36] : memref<128x32xf32, #tpu.memory_space<vmem>>, vector<128x32xf32>
    %cst_37 = arith.constant dense<0.000000e+00> : vector<64x32xf32>
    %96 = tpu.matmul %94, %95, %cst_37 {dimension_numbers = #tpu.dot_dimension_numbers<[1], [0], [0], [1], [0, 0, 1, 1], [], []>} : vector<64x128xf32>, vector<128x32xf32>, vector<64x32xf32> -> vector<64x32xf32>
    %97 = arith.addf %79, %96 : vector<64x32xf32>
    %c0_38 = arith.constant 0 : index
    %c0_39 = arith.constant 0 : index
    %98 = vector.load %arg8[%c0_38, %c0_39] : memref<64x64xf32, #tpu.memory_space<vmem>>, vector<64x64xf32>
    %cst_40 = arith.constant dense<0.000000e+00> : vector<64x32xf32>
    %99 = tpu.matmul %98, %97, %cst_40 {dimension_numbers = #tpu.dot_dimension_numbers<[1], [0], [0], [1], [0, 0, 1, 1], [], []>} : vector<64x64xf32>, vector<64x32xf32>, vector<64x32xf32> -> vector<64x32xf32>
    %cst_41 = arith.constant 0.000000e+00 : f32
    %100 = vector.broadcast %cst_41 : f32 to vector<16x16xf32>
    %101 = vector.extract_strided_slice %99 {offsets = [0, 0], sizes = [16, 32], strides = [1, 1]} : vector<64x32xf32> to vector<16x32xf32>
    %c0_42 = arith.constant 0 : index
    %c0_43 = arith.constant 0 : index
    %102 = vector.load %arg6[%c0_42, %c0_43] : memref<128x16xf32, #tpu.memory_space<vmem>>, vector<32x16xf32>
    %cst_44 = arith.constant dense<0.000000e+00> : vector<16x16xf32>
    %103 = tpu.matmul %101, %102, %cst_44 {dimension_numbers = #tpu.dot_dimension_numbers<[1], [0], [0], [1], [0, 0, 1, 1], [], []>} : vector<16x32xf32>, vector<32x16xf32>, vector<16x16xf32> -> vector<16x16xf32>
    %104 = arith.addf %100, %103 : vector<16x16xf32>
    %105 = vector.extract_strided_slice %99 {offsets = [16, 0], sizes = [16, 32], strides = [1, 1]} : vector<64x32xf32> to vector<16x32xf32>
    %c32 = arith.constant 32 : index
    %c0_45 = arith.constant 0 : index
    %106 = vector.load %arg6[%c32, %c0_45] : memref<128x16xf32, #tpu.memory_space<vmem>>, vector<32x16xf32>
    %cst_46 = arith.constant dense<0.000000e+00> : vector<16x16xf32>
    %107 = tpu.matmul %105, %106, %cst_46 {dimension_numbers = #tpu.dot_dimension_numbers<[1], [0], [0], [1], [0, 0, 1, 1], [], []>} : vector<16x32xf32>, vector<32x16xf32>, vector<16x16xf32> -> vector<16x16xf32>
    %108 = arith.addf %104, %107 : vector<16x16xf32>
    %109 = vector.extract_strided_slice %99 {offsets = [32, 0], sizes = [16, 32], strides = [1, 1]} : vector<64x32xf32> to vector<16x32xf32>
    %c64 = arith.constant 64 : index
    %c0_47 = arith.constant 0 : index
    %110 = vector.load %arg6[%c64, %c0_47] : memref<128x16xf32, #tpu.memory_space<vmem>>, vector<32x16xf32>
    %cst_48 = arith.constant dense<0.000000e+00> : vector<16x16xf32>
    %111 = tpu.matmul %109, %110, %cst_48 {dimension_numbers = #tpu.dot_dimension_numbers<[1], [0], [0], [1], [0, 0, 1, 1], [], []>} : vector<16x32xf32>, vector<32x16xf32>, vector<16x16xf32> -> vector<16x16xf32>
    %112 = arith.addf %108, %111 : vector<16x16xf32>
    %113 = vector.extract_strided_slice %99 {offsets = [48, 0], sizes = [16, 32], strides = [1, 1]} : vector<64x32xf32> to vector<16x32xf32>
    %c96 = arith.constant 96 : index
    %c0_49 = arith.constant 0 : index
    %114 = vector.load %arg6[%c96, %c0_49] : memref<128x16xf32, #tpu.memory_space<vmem>>, vector<32x16xf32>
    %cst_50 = arith.constant dense<0.000000e+00> : vector<16x16xf32>
    %115 = tpu.matmul %113, %114, %cst_50 {dimension_numbers = #tpu.dot_dimension_numbers<[1], [0], [0], [1], [0, 0, 1, 1], [], []>} : vector<16x32xf32>, vector<32x16xf32>, vector<16x16xf32> -> vector<16x16xf32>
    %116 = arith.addf %112, %115 : vector<16x16xf32>
    %c0_51 = arith.constant 0 : index
    %c0_52 = arith.constant 0 : index
    %117 = vector.load %arg9[%c0_51, %c0_52] : memref<16x16xf32, #tpu.memory_space<vmem>>, vector<16x16xf32>
    tpu.vector_store %arg9[%c0_51, %c0_52], %116 {strides = array<i32>} : memref<16x16xf32, #tpu.memory_space<vmem>>, vector<16x16xf32>,
    return
  }
  func.func @transform_0(%arg0: i32) -> (i32, i32) {
    %c0_i32 = arith.constant 0 : i32
    %c0_i32_0 = arith.constant 0 : i32
    return %arg0, %c0_i32 : i32, i32
  }
  func.func @transform_1(%arg0: i32) -> (i32, i32) {
    %c0_i32 = arith.constant 0 : i32
    %c0_i32_0 = arith.constant 0 : i32
    %c0_i32_1 = arith.constant 0 : i32
    return %c0_i32, %c0_i32_0 : i32, i32
  }
  func.func @transform_2(%arg0: i32) -> (i32, i32) {
    %c0_i32 = arith.constant 0 : i32
    %c0_i32_0 = arith.constant 0 : i32
    %c0_i32_1 = arith.constant 0 : i32
    return %c0_i32, %c0_i32_0 : i32, i32
  }
  func.func @transform_3(%arg0: i32) -> (i32, i32) {
    %c0_i32 = arith.constant 0 : i32
    %c0_i32_0 = arith.constant 0 : i32
    %c0_i32_1 = arith.constant 0 : i32
    return %c0_i32, %c0_i32_0 : i32, i32
  }
  func.func @transform_4(%arg0: i32) -> (i32, i32) {
    %c0_i32 = arith.constant 0 : i32
    %c0_i32_0 = arith.constant 0 : i32
    %c0_i32_1 = arith.constant 0 : i32
    return %c0_i32, %c0_i32_0 : i32, i32
  }
  func.func @transform_5(%arg0: i32) -> (i32, i32) {
    %c0_i32 = arith.constant 0 : i32
    %c0_i32_0 = arith.constant 0 : i32
    %c0_i32_1 = arith.constant 0 : i32
    return %c0_i32, %c0_i32_0 : i32, i32
  }
  func.func @transform_6(%arg0: i32) -> (i32, i32) {
    %c0_i32 = arith.constant 0 : i32
    %c0_i32_0 = arith.constant 0 : i32
    %c0_i32_1 = arith.constant 0 : i32
    return %c0_i32, %c0_i32_0 : i32, i32
  }
  func.func @transform_7(%arg0: i32) -> (i32, i32) {
    %c0_i32 = arith.constant 0 : i32
    %c0_i32_0 = arith.constant 0 : i32
    %c0_i32_1 = arith.constant 0 : i32
    return %c0_i32, %c0_i32_0 : i32, i32
  }
  func.func @transform_8(%arg0: i32) -> (i32, i32) {
    %c0_i32 = arith.constant 0 : i32
    %c0_i32_0 = arith.constant 0 : i32
    return %arg0, %c0_i32 : i32, i32
  }
}

</mosaic_0001>

<bundles_post_ra>
// kernel: attention_redfb_forward.2
= control target key start
LH: loop header
LB: loop body
LE: loop exit
PB: predicated region body
PF: predicated region fallthrough
CT: control target
= control target key end

     0   :  { %s255_s0 = inlined_call_operand.vmem [shape: f32[8,8,128], index: 0, kind: input, shape index: {}]   ;;  %s256_s1 = inlined_call_operand.vmem [shape: f32[8,8,128], index: 1, kind: input, shape index: {}]   ;;  %s257_s2 = inlined_call_operand.vmem [shape: f32[1,128], index: 2, kind: input, shape index: {}]   ;;  %s258_s3 = inlined_call_operand.vmem [shape: f32[8,8,128], index: 3, kind: output, shape index: {}]  }
   0x1   :  { %v170_v0 = vld [vmem:[%s257_s2] ss:$0 sm:$0xff]  ;;  %v126_v8 = vld [vmem:[%s256_s1 + $0x8] sm:$0xff]  ;;  %v129_v16 = vld [vmem:[%s256_s1 + $0x10] sm:$0xff] }
   0x2   :  { %v23_v1 = vld [vmem:[%s255_s0] sm:$0xff]  ;;  %v27_v3 = vmul.f32 0.0, %v170_v0  ;;  %v125_v9 = vld [vmem:[%s255_s0 + $0x8] sm:$0xff]  ;;  %v128_v17 = vld [vmem:[%s255_s0 + $0x10] sm:$0xff] }
   0x3   :  { %v30_v2 = vld [vmem:[%s256_s1] sm:$0xff]  ;;  %v132_v24 = vld [vmem:[%s256_s1 + $0x18] sm:$0xff]  ;;  %v138_v40 = vld [vmem:[%s256_s1 + $0x28] sm:$0xff] }
   0x4   :  { %v28_v4 = vadd.f32 %v27_v3, %v23_v1  ;;  %v32_v5 = vadd.f32 %v30_v2, %v27_v3  ;;  %v131_v25 = vld [vmem:[%s255_s0 + $0x18] sm:$0xff]  ;;  %v135_v32 = vld [vmem:[%s256_s1 + $0x20] sm:$0xff]  ;;  %v137_v41 = vld [vmem:[%s255_s0 + $0x28] sm:$0xff] }
   0x5   :  { %v134_v33 = vld [vmem:[%s255_s0 + $0x20] sm:$0xff]  ;;  %v141_v48 = vld [vmem:[%s256_s1 + $0x30] sm:$0xff]  ;;  %v143_v56 = vld [vmem:[%s255_s0 + $0x38] sm:$0xff] }
   0x6   :  { %v29_v6 = vmax.f32 %v28_v4, 0.0  ;;  %v33_v7 = vmax.f32 %v32_v5, 0.0  ;;  %v140_v49 = vld [vmem:[%s255_s0 + $0x30] sm:$0xff] }
   0x8   :  { %34 = vst [vmem:[%s258_s3] sm:$0xff] %v29_v6  ;;  %v42_v10 = vmul.f32 %v170_v0, %v29_v6  ;;  %v37_v11 = vmul.f32 %v170_v0, %v33_v7 }
   0xa   :  { %v43_v12 = vadd.f32 %v126_v8, %v42_v10  ;;  %v38_v13 = vadd.f32 %v125_v9, %v37_v11 }
   0xc   :  { %v39_v14 = vmax.f32 %v38_v13, 0.0  ;;  %v44_v15 = vmax.f32 %v43_v12, 0.0 }
   0xe   :  { %127 = vst [vmem:[%s258_s3 + $0x8] sm:$0xff] %v39_v14  ;;  %v54_v18 = vmul.f32 %v170_v0, %v39_v14  ;;  %v49_v19 = vmul.f32 %v170_v0, %v44_v15 }
  0x10   :  { %v55_v20 = vadd.f32 %v129_v16, %v54_v18  ;;  %v50_v21 = vadd.f32 %v128_v17, %v49_v19 }
  0x12   :  { %v51_v22 = vmax.f32 %v50_v21, 0.0  ;;  %v56_v23 = vmax.f32 %v55_v20, 0.0 }
  0x14   :  { %130 = vst [vmem:[%s258_s3 + $0x10] sm:$0xff] %v51_v22  ;;  %v66_v26 = vmul.f32 %v170_v0, %v51_v22  ;;  %v61_v27 = vmul.f32 %v170_v0, %v56_v23 }
  0x16   :  { %v67_v28 = vadd.f32 %v132_v24, %v66_v26  ;;  %v62_v29 = vadd.f32 %v131_v25, %v61_v27 }
  0x18   :  { %v63_v30 = vmax.f32 %v62_v29, 0.0  ;;  %v68_v31 = vmax.f32 %v67_v28, 0.0 }
  0x1a   :  { %133 = vst [vmem:[%s258_s3 + $0x18] sm:$0xff] %v63_v30  ;;  %v78_v34 = vmul.f32 %v170_v0, %v63_v30  ;;  %v73_v35 = vmul.f32 %v170_v0, %v68_v31 }
  0x1c   :  { %v79_v36 = vadd.f32 %v135_v32, %v78_v34  ;;  %v74_v37 = vadd.f32 %v134_v33, %v73_v35 }
  0x1e   :  { %v75_v38 = vmax.f32 %v74_v37, 0.0  ;;  %v80_v39 = vmax.f32 %v79_v36, 0.0 }
  0x20   :  { %136 = vst [vmem:[%s258_s3 + $0x20] sm:$0xff] %v75_v38  ;;  %v90_v42 = vmul.f32 %v170_v0, %v75_v38  ;;  %v85_v43 = vmul.f32 %v170_v0, %v80_v39 }
  0x22   :  { %v91_v44 = vadd.f32 %v138_v40, %v90_v42  ;;  %v86_v45 = vadd.f32 %v137_v41, %v85_v43 }
  0x24   :  { %v87_v46 = vmax.f32 %v86_v45, 0.0  ;;  %v92_v47 = vmax.f32 %v91_v44, 0.0 }
  0x26   :  { %139 = vst [vmem:[%s258_s3 + $0x28] sm:$0xff] %v87_v46  ;;  %v102_v50 = vmul.f32 %v170_v0, %v87_v46  ;;  %v97_v51 = vmul.f32 %v170_v0, %v92_v47 }
  0x28   :  { %v103_v52 = vadd.f32 %v141_v48, %v102_v50  ;;  %v98_v53 = vadd.f32 %v140_v49, %v97_v51 }
  0x2a   :  { %v99_v54 = vmax.f32 %v98_v53, 0.0  ;;  %v104_v55 = vmax.f32 %v103_v52, 0.0 }
  0x2c   :  { %142 = vst [vmem:[%s258_s3 + $0x30] sm:$0xff] %v99_v54  ;;  %v109_v57 = vmul.f32 %v170_v0, %v104_v55 }
  0x2e   :  { %v110_v58 = vadd.f32 %v143_v56, %v109_v57 }
  0x30   :  { %v111_v59 = vmax.f32 %v110_v58, 0.0 }
  0x32   :  { %145 = vst [vmem:[%s258_s3 + $0x38] sm:$0xff] %v111_v59 }

// kernel: attention_redfb_forward.3
= control target key start
LH: loop header
LB: loop body
LE: loop exit
PB: predicated region body
PF: predicated region fallthrough
CT: control target
= control target key end

     0   :  { %vm41_vm0 = vcmask 261120   ;;  %s2271_s28 = smov 96   ;;  %s2272_s29 = smov 88   ;;  %vm147_vm1 = vcmask 64512   ;;  %vm229_vm2 = vcmask 523264   ;;  %vm1357_vm3 = vcmask 130048   ;;  %s3427_s1 = inlined_call_operand.vmem [shape: f32[32,96], index: 1, kind: input, shape index: {}]   ;;  %s3428_s0 = inlined_call_operand.vmem [shape: f32[64,32], index: 0, kind: input, shape index: {}]   ;;  %s3429_s6 = inlined_call_operand.vmem [shape: f32[64,64], index: 6, kind: input, shape index: {}]   ;;  %s3430_s2 = inlined_call_operand.vmem [shape: f32[32,32], index: 2, kind: input, shape index: {}]   ;;  %s3431_s3 = inlined_call_operand.vmem [shape: f32[32,128], index: 3, kind: input, shape index: {}]   ;;  %s3432_s4 = inlined_call_operand.vmem [shape: f32[128,32], index: 4, kind: input, shape index: {}]   ;;  %s3433_s7 = inlined_call_operand.vmem [shape: f32[64,64], index: 7, kind: input, shape index: {}]   ;;  %s3434_s5 = inlined_call_operand.vmem [shape: f32[128,16], index: 5, kind: input, shape index: {}]   ;;  %s3435_s8 = inlined_call_operand.vmem [shape: f32[16,16], index: 8, kind: output, shape index: {}]  }
   0x1   :  { %v40_v0 = vld [vmem:[%s3427_s1 + $0x18] sm:$0xff]  ;;  %v39_v1 = vld [vmem:[%s3427_s1 + $0x10] sm:$0xff]  ;;  %v38_v2 = vld [vmem:[%s3427_s1 + $0x8] sm:$0xff]  ;;  %s2273_s30 = smov 64   ;;  %s2274_s9 = smov 72   ;;  %vm1366_vm4 = vcmask 195584  }
   0x2   :  { %78 = vmatpush.msra.mxu0 %v40_v0  ;;  %v37_v3 = vld [vmem:[%s3427_s1] sm:$0xff]  ;;  %v30_v5 = vld [vmem:[%s3428_s0 + $0x8] sm:$0xff]  ;;  %v31_v6 = vld [vmem:[%s3428_s0 + $0x10] sm:$0xff]  ;;  %s2275_s10 = smov 80   ;;  %s2276_s11 = smov 120  }
   0x3   :  { %v29_v4 = vld [vmem:[%s3428_s0] sm:$0xff]  ;;  %v32_v7 = vld [vmem:[%s3428_s0 + $0x18] sm:$0xff]  ;;  %v34_v9 = vld [vmem:[%s3428_s0 + $0x28] sm:$0xff]  ;;  %s2277_s12 = smov 112   ;;  %s2278_s13 = smov 104  }
   0x4   :  { %79 = vmatpush.msra.mxu0 %v39_v1  ;;  %v33_v8 = vld [vmem:[%s3428_s0 + $0x20] sm:$0xff]  ;;  %v35_v10 = vld [vmem:[%s3428_s0 + $0x30] sm:$0xff]  ;;  %v36_v11 = vld [vmem:[%s3428_s0 + $0x38] sm:$0xff] }
   0x6   :  { %80 = vmatpush.msra.mxu0 %v38_v2 }
   0x8   :  { %81 = vmatpush.msra.mxu0 %v37_v3 }
   0x9   :  { %1873 = vmatmul.msk.f32.vlgmr.msra.gmra.mxu0 %vm41_vm0, %v29_v4 }
  0x11   :  { %1874 = vmatmul.msk.f32.gmra.mxu0 %vm41_vm0, %v30_v5 }
  0x19   :  { %1875 = vmatmul.msk.f32.gmra.mxu0 %vm41_vm0, %v31_v6 }
  0x21   :  { %1876 = vmatmul.msk.f32.gmra.mxu0 %vm41_vm0, %v32_v7 }
  0x29   :  { %1877 = vmatmul.msk.f32.gmra.mxu0 %vm41_vm0, %v33_v8 }
  0x31   :  { %1878 = vmatmul.msk.f32.gmra.mxu0 %vm41_vm0, %v34_v9 }
  0x39   :  { %1879 = vmatmul.msk.f32.gmra.mxu0 %vm41_vm0, %v35_v10 }
  0x41   :  { %1880 = vmatmul.msk.f32.gmra.mxu0 %vm41_vm0, %v36_v11 }
  0x86   :  { %v2374_v12 = vpop.f32.mrf.mxu0 }
  0x87   :  { %v115_v25 = vmul.f32 0.35355338, %v2374_v12 }
  0x8e   :  { %v2376_v13 = vpop.f32.mrf.mxu0 }
  0x8f   :  { %133 = vrot.lane.b32.xlu0 %v2376_v13, %s2271_s28  ;;  %v2388_v19 = vpack.i.bf16 %v2374_v12, %v2376_v13  ;;  %v2418_v24 = vmul.f32 0.35355338, %v2376_v13 }
  0x96   :  { %v89_v14 = vpop.f32.mrf.mxu0 }
  0x97   :  { %135 = vrot.lane.b32.xlu2 %v89_v14, %s2271_s28  ;;  %v2426_v26 = vmul.f32 0.35355338, %v89_v14 }
  0x9e   :  { %v92_v15 = vpop.f32.mrf.mxu0 }
  0x9f   :  { %137 = vrot.lane.b32.xlu2 %v92_v15, %s2271_s28  ;;  %v2396_v21 = vpack.i.bf16 %v89_v14, %v92_v15  ;;  %v118_v27 = vmul.f32 0.35355338, %v92_v15 }
  0xa6   :  { %v95_v16 = vpop.f32.mrf.mxu0 }
  0xa7   :  { %431 = vrot.lane.b32.xlu2 %v95_v16, %s2272_s29  ;;  %139 = vrot.lane.b32.xlu1 %v95_v16, %s2271_s28  ;;  %v2410_v23 = vmul.f32 0.35355338, %v95_v16 }
  0xae   :  { %v98_v17 = vpop.f32.mrf.mxu0 }
  0xaf   :  { %141 = vrot.lane.b32.xlu1 %v98_v17, %s2271_s28  ;;  %v2408_v22 = vpack.i.bf16 %v95_v16, %v98_v17  ;;  %v2446_v28 = vmul.f32 0.35355338, %v98_v17 }
  0xb6   :  { %v2380_v18 = vpop.f32.mrf.mxu0 }
  0xb7   :  { %131 = vrot.lane.b32.xlu1 %v2374_v12, %s2271_s28  ;;  %435 = vrot.lane.b32.xlu2 %v2380_v18, %s2272_s29  ;;  %v2449_v29 = vmul.f32 0.35355338, %v2380_v18 }
  0xb8   :  { %143 = vrot.lane.b32.xlu0 %v2380_v18, %s2271_s28 }
  0xbe   :  { %v2390_v20 = vpop.f32.mrf.mxu0 }
  0xbf   :  { %429 = vrot.lane.b32.xlu1 %v92_v15, %s2272_s29  ;;  %2050 = vrot.lane.b32.xlu2 %v2388_v19, %s2273_s30  ;;  %v2481_v37 = vpack.i.bf16 %v2380_v18, %v2390_v20  ;;  %v2491_v40 = vmul.f32 0.35355338, %v2390_v20 }
  0xc0   :  { %145 = vrot.lane.b32.xlu0 %v2390_v20, %s2271_s28 }
  0xc7   :  { %2040 = vrot.lane.b32.xlu1 %v2396_v21, %s2273_s30  ;;  %423 = vrot.lane.b32.xlu2 %v2374_v12, %s2272_s29 }
  0xc8   :  { %427 = vrot.lane.b32.xlu0 %v89_v14, %s2272_s29 }
  0xcf   :  { %433 = vrot.lane.b32.xlu1 %v98_v17, %s2272_s29  ;;  %999 = vrot.lane.b32.xlu2 %v2380_v18, %s2274_s9 }
  0xd0   :  { %717 = vrot.lane.b32.xlu0 %v2380_v18, %s2275_s10 }
  0xd7   :  { %2045 = vrot.lane.b32.xlu1 %v2408_v22, %s2273_s30  ;;  %991 = vrot.lane.b32.xlu2 %v89_v14, %s2274_s9 }
  0xd8   :  { %415 = vrot.lane.b32.xlu0 %v2410_v23, %s2276_s11 }
  0xdf   :  { %425 = vrot.lane.b32.xlu1 %v2376_v13, %s2272_s29  ;;  %691 = vrot.lane.b32.xlu2 %v2418_v24, %s2277_s12 }
  0xe0   :  { %715 = vrot.lane.b32.xlu0 %v98_v17, %s2275_s10 }
  0xe7   :  { %407 = vrot.lane.b32.xlu1 %v115_v25, %s2276_s11  ;;  %975 = vrot.lane.b32.xlu2 %v2426_v26, %s2278_s13 }
  0xe8   :  { %713 = vrot.lane.b32.xlu0 %v95_v16, %s2275_s10 }
  0xef   :  { %409 = vrot.lane.b32.xlu1 %v2418_v24, %s2276_s11  ;;  %697 = vrot.lane.b32.xlu2 %v2410_v23, %s2277_s12 }
  0xf0   :  { %997 = vrot.lane.b32.xlu0 %v98_v17, %s2274_s9 }
  0xf1   :  { %v136_v34 = vpop.permute.xlu2 %135 }
  0xf7   :  { %411 = vrot.lane.b32.xlu1 %v2426_v26, %s2276_s11  ;;  %719 = vrot.lane.b32.xlu2 %v2390_v20, %s2275_s10 }
  0xf8   :  { %711 = vrot.lane.b32.xlu0 %v92_v15, %s2275_s10 }
  0xf9   :  { %v138_v38 = vpop.permute.xlu2 %137 }
  0xff   :  { %413 = vrot.lane.b32.xlu1 %v118_v27, %s2276_s11  ;;  %1001 = vrot.lane.b32.xlu2 %v2390_v20, %s2274_s9 }
 0x100   :  { %995 = vrot.lane.b32.xlu0 %v95_v16, %s2274_s9 }
 0x101   :  { %v134_v30 = vpop.permute.xlu0 %133  ;;  %v432_v48 = vpop.permute.xlu2 %431 }
 0x107   :  { %417 = vrot.lane.b32.xlu1 %v2446_v28, %s2276_s11 }
 0x108   :  { %419 = vrot.lane.b32.xlu0 %v2449_v29, %s2276_s11 }
 0x10f   :  { %709 = vrot.lane.b32.xlu1 %v89_v14, %s2275_s10 }
 0x110   :  { %707 = vrot.lane.b32.xlu0 %v2376_v13, %s2275_s10 }
 0x111   :  { %v436_v51 = vpop.permute.xlu2 %435 }
 0x117   :  { %993 = vrot.lane.b32.xlu1 %v92_v15, %s2274_s9 }
 0x118   :  { %989 = vrot.lane.b32.xlu0 %v2376_v13, %s2274_s9 }
 0x119   :  { %v140_v32 = vpop.permute.xlu1 %139  ;;  %v2051_v54 = vpop.permute.xlu2 %2050 }
 0x11f   :  { %705 = vrot.lane.b32.xlu1 %v2374_v12, %s2275_s10  ;;  %s2283_s10 = smov 16  }
 0x120   :  { %971 = vrot.lane.b32.xlu0 %v115_v25, %s2278_s13 }
 0x121   :  { %v142_v35 = vpop.permute.xlu1 %141  ;;  %v424_v57 = vpop.permute.xlu2 %423 }
 0x127   :  { %689 = vrot.lane.b32.xlu1 %v115_v25, %s2277_s12 }
 0x128   :  { %693 = vrot.lane.b32.xlu0 %v2426_v26, %s2277_s12 }
 0x129   :  { %v132_v42 = vpop.permute.xlu1 %131  ;;  %v1000_v61 = vpop.permute.xlu2 %999 }
 0x12a   :  { %v144_v31 = vpop.permute.xlu0 %143 }
 0x12f   :  { %987 = vrot.lane.b32.xlu1 %v2374_v12, %s2274_s9  ;;  %s2282_s9 = smov 8  }
 0x130   :  { %977 = vrot.lane.b32.xlu0 %v118_v27, %s2278_s13 }
 0x131   :  { %v430_v44 = vpop.permute.xlu1 %429  ;;  %v2536_v0 = vpop.permute.xlu2 %991 }
 0x132   :  { %v146_v33 = vpop.permute.xlu0 %145 }
 0x133   :  { %1881 = vmatpush.xpose.msk.msra.mxu1 %vm147_vm1, %v146_v33  ;;  %v2591_v33 = vld [vmem:[%s3429_s6 + $0x8] sm:$0xff] }
 0x137   :  { %1882 = vmatpush.xpose.msk.msra.mxu1 %vm147_vm1, %v144_v31  ;;  %973 = vrot.lane.b32.xlu1 %v2418_v24, %s2278_s13 }
 0x138   :  { %437 = vrot.lane.b32.xlu0 %v2390_v20, %s2272_s29  ;;  %v2052_v20 = vunpack.i.l.bf16 %v2051_v54  ;;  %s2280_s29 = smov 48  }
 0x139   :  { %v2041_v46 = vpop.permute.xlu1 %2040  ;;  %v2540_v3 = vpop.permute.xlu2 %691 }
 0x13a   :  { %v2476_v36 = vpop.permute.xlu0 %427  ;;  %v2042_v16 = vunpack.i.l.bf16 %v2041_v46  ;;  %v2043_v18 = vunpack.i.h.bf16 %v2041_v46 }
 0x13b   :  { %1883 = vmatpush.xpose.msk.msra.mxu1 %vm147_vm1, %v142_v35 }
 0x13f   :  { %1884 = vmatpush.xpose.msk.msra.mxu1 %vm147_vm1, %v140_v32  ;;  %695 = vrot.lane.b32.xlu1 %v118_v27, %s2277_s12 }
 0x140   :  { %2055 = vrot.lane.b32.xlu0 %v2481_v37, %s2273_s30  ;;  %s2281_s30 = smov 40  }
 0x141   :  { %v434_v50 = vpop.permute.xlu1 %433  ;;  %v2546_v6 = vpop.permute.xlu2 %975 }
 0x142   :  { %v2487_v39 = vpop.permute.xlu0 %717 }
 0x143   :  { %1885 = vmatpush.xpose.msk.msra.mxu1 %vm147_vm1, %v138_v38 }
 0x147   :  { %1886 = vmatpush.xpose.msk.msra.mxu1 %vm147_vm1, %v136_v34  ;;  %979 = vrot.lane.b32.xlu1 %v2410_v23, %s2278_s13 }
 0x148   :  { %421 = vrot.lane.b32.xlu0 %v2491_v40, %s2276_s11  ;;  %s2284_s11 = smov 24  }
 0x149   :  { %v2046_v53 = vpop.permute.xlu1 %2045  ;;  %v2552_v10 = vpop.permute.xlu2 %697 }
 0x14a   :  { %v2498_v41 = vpop.permute.xlu0 %415  ;;  %v2047_v13 = vunpack.i.l.bf16 %v2046_v53  ;;  %v2048_v14 = vunpack.i.h.bf16 %v2046_v53 }
 0x14b   :  { %1887 = vmatpush.xpose.msk.msra.mxu1 %vm147_vm1, %v134_v30 }
 0x14f   :  { %1888 = vmatpush.xpose.msk.msra.mxu1 %vm147_vm1, %v132_v42  ;;  %701 = vrot.lane.b32.xlu1 %v2449_v29, %s2277_s12 }
 0x151   :  { %v426_v56 = vpop.permute.xlu1 %425  ;;  %v720_v17 = vpop.permute.xlu2 %719 }
 0x152   :  { %1889 = vmatmul.msk.f32.vlgmr.msra.gmra.mxu1 %vm147_vm1, %v115_v25  ;;  %v2505_v43 = vpop.permute.xlu0 %715 }
 0x159   :  { %v408_v59 = vpop.permute.xlu1 %407  ;;  %v1002_v25 = vpop.permute.xlu2 %1001 }
 0x15a   :  { %1890 = vmatmul.msk.f32.gmra.mxu1 %vm147_vm1, %v2418_v24  ;;  %v2509_v45 = vpop.permute.xlu0 %713 }
 0x161   :  { %v410_v63 = vpop.permute.xlu1 %409 }
 0x162   :  { %1891 = vmatmul.msk.f32.gmra.mxu1 %vm147_vm1, %v2426_v26  ;;  %v2513_v47 = vpop.permute.xlu0 %997  ;;  %v2572_v26 = vld [vmem:[%s3429_s6] sm:$0xff] }
 0x169   :  { %v412_v2 = vpop.permute.xlu1 %411 }
 0x16a   :  { %1892 = vmatmul.msk.f32.gmra.mxu1 %vm147_vm1, %v118_v27  ;;  %v2516_v49 = vpop.permute.xlu0 %711 }
 0x171   :  { %v2544_v5 = vpop.permute.xlu1 %413 }
 0x172   :  { %1893 = vmatmul.msk.f32.gmra.mxu1 %vm147_vm1, %v2410_v23  ;;  %v2520_v52 = vpop.permute.xlu0 %995  ;;  %v2053_v23 = vunpack.i.h.bf16 %v2051_v54 }
 0x179   :  { %v2550_v8 = vpop.permute.xlu1 %417 }
 0x17a   :  { %1894 = vmatmul.msk.f32.gmra.mxu1 %vm147_vm1, %v2446_v28  ;;  %v2524_v55 = vpop.permute.xlu0 %419 }
 0x181   :  { %v710_v15 = vpop.permute.xlu1 %709 }
 0x182   :  { %1895 = vmatmul.msk.f32.gmra.mxu1 %vm147_vm1, %v2449_v29  ;;  %v2528_v58 = vpop.permute.xlu0 %707 }
 0x189   :  { %v994_v24 = vpop.permute.xlu1 %993 }
 0x18a   :  { %v2530_v60 = vpop.permute.xlu0 %989  ;;  %1896 = vmatmul.msk.f32.gmra.mxu1 %vm147_vm1, %v2491_v40 }
 0x191   :  { %v706_v27 = vpop.permute.xlu1 %705 }
 0x192   :  { %v2534_v62 = vpop.permute.xlu0 %971 }
 0x19a   :  { %v2538_v1 = vpop.permute.xlu0 %693 }
 0x1a2   :  { %v2542_v4 = vpop.permute.xlu0 %977 }
 0x1aa   :  { %v438_v7 = vpop.permute.xlu0 %437 }
 0x1ab   :  { %1905 = vmatpush.xpose.msk.msra.mxu3 %vm147_vm1, %v438_v7 }
 0x1af   :  { %1906 = vmatpush.xpose.msk.msra.mxu3 %vm147_vm1, %v436_v51 }
 0x1b2   :  { %v2056_v9 = vpop.permute.xlu0 %2055 }
 0x1b3   :  { %1907 = vmatpush.xpose.msk.msra.mxu3 %vm147_vm1, %v434_v50  ;;  %v2057_v11 = vunpack.i.l.bf16 %v2056_v9  ;;  %v2058_v12 = vunpack.i.h.bf16 %v2056_v9 }
 0x1b5   :  { %374 = vmatpush.msra.mxu2 %v2057_v11 }
 0x1b7   :  { %375 = vmatpush.msra.mxu2 %v2058_v12  ;;  %1908 = vmatpush.xpose.msk.msra.mxu3 %vm147_vm1, %v432_v48  ;;  %v2634_v48 = vld [vmem:[%s3429_s6 + $0x28] sm:$0xff] }
 0x1b9   :  { %376 = vmatpush.msra.mxu2 %v2047_v13 }
 0x1ba   :  { %v422_v51 = vpop.permute.xlu0 %421 }
 0x1bb   :  { %377 = vmatpush.msra.mxu2 %v2048_v14  ;;  %1909 = vmatpush.xpose.msk.msra.mxu3 %vm147_vm1, %v430_v44 }
 0x1bd   :  { %378 = vmatpush.msra.mxu2 %v2042_v16 }
 0x1bf   :  { %379 = vmatpush.msra.mxu2 %v2043_v18  ;;  %1910 = vmatpush.xpose.msk.msra.mxu3 %vm147_vm1, %v2476_v36  ;;  %v2598_v36 = vpop.permute.xlu1 %689 }
 0x1c1   :  { %380 = vmatpush.msra.mxu2 %v2052_v20 }
 0x1c3   :  { %381 = vmatpush.msra.mxu2 %v2053_v23  ;;  %1911 = vmatpush.xpose.msk.msra.mxu3 %vm147_vm1, %v426_v56  ;;  %v2659_v56 = vld [vmem:[%s3429_s6 + $0x18] sm:$0xff] }
 0x1c5   :  { %1929 = vmatpush.xpose.msk.msrb.mxu2 %vm147_vm1, %v720_v17 }
 0x1c7   :  { %1912 = vmatpush.xpose.msk.msra.mxu3 %vm147_vm1, %v424_v57 }
 0x1c9   :  { %1930 = vmatpush.xpose.msk.msrb.mxu2 %vm147_vm1, %v2487_v39  ;;  %v2610_v39 = vld [vmem:[%s3429_s6 + $0x10] sm:$0xff] }
 0x1ca   :  { %1913 = vmatmul.msk.f32.vlgmr.msra.gmra.mxu3 %vm147_vm1, %v408_v59  ;;  %v2665_v59 = vld [vmem:[%s3429_s6 + $0x30] sm:$0xff] }
 0x1cb   :  { %1953 = vmatpush.xpose.msk.msrb.mxu3 %vm147_vm1, %v1002_v25 }
 0x1cd   :  { %1931 = vmatpush.xpose.msk.msrb.mxu2 %vm147_vm1, %v2505_v43 }
 0x1cf   :  { %1954 = vmatpush.xpose.msk.msrb.mxu3 %vm147_vm1, %v1000_v61  ;;  %v205_v30 = vpop.f32.mrf.mxu1  ;;  %v2672_v61 = vld [vmem:[%s3429_s6 + $0x20] sm:$0xff] }
 0x1d0   :  { %v2575_v31 = vadd.f32 %v205_v30, %v2572_v26 }
 0x1d1   :  { %1932 = vmatpush.xpose.msk.msrb.mxu2 %vm147_vm1, %v2509_v45  ;;  %v988_v45 = vpop.permute.xlu1 %987 }
 0x1d2   :  { %1914 = vmatmul.msk.f32.gmra.mxu3 %vm147_vm1, %v410_v63  ;;  %v230_v32 = vsel %vm229_vm2, %v2575_v31, -inf }
 0x1d3   :  { %1955 = vmatpush.xpose.msk.msrb.mxu3 %vm147_vm1, %v2513_v47  ;;  %231 = vmax.xlane.f32.xlu2 %v230_v32 }
 0x1d5   :  { %1933 = vmatpush.xpose.msk.msrb.mxu2 %vm147_vm1, %v2516_v49 }
 0x1d7   :  { %1956 = vmatpush.xpose.msk.msrb.mxu3 %vm147_vm1, %v2520_v52  ;;  %v208_v34 = vpop.f32.mrf.mxu1  ;;  %v2647_v52 = vld [vmem:[%s3429_s6 + $0x38] sm:$0xff]  ;;  %s2279_s6 = smov 56  }
 0x1d8   :  { %v2594_v35 = vadd.f32 %v208_v34, %v2591_v33 }
 0x1d9   :  { %1934 = vmatpush.xpose.msk.msrb.mxu2 %vm147_vm1, %v710_v15 }
 0x1da   :  { %1915 = vmatmul.msk.f32.gmra.mxu3 %vm147_vm1, %v412_v2  ;;  %v233_v38 = vsel %vm229_vm2, %v2594_v35, -inf }
 0x1db   :  { %1957 = vmatpush.xpose.msk.msrb.mxu3 %vm147_vm1, %v994_v24  ;;  %234 = vmax.xlane.f32.xlu0 %v233_v38 }
 0x1dd   :  { %1935 = vmatpush.xpose.msk.msrb.mxu2 %vm147_vm1, %v2528_v58  ;;  %v974_v58 = vpop.permute.xlu1 %973 }
 0x1df   :  { %1958 = vmatpush.xpose.msk.msrb.mxu3 %vm147_vm1, %v2536_v0  ;;  %v211_v42 = vpop.f32.mrf.mxu1 }
 0x1e0   :  { %v2613_v43 = vadd.f32 %v211_v42, %v2610_v39 }
 0x1e1   :  { %1936 = vmatpush.xpose.msk.msrb.mxu2 %vm147_vm1, %v706_v27 }
 0x1e2   :  { %1916 = vmatmul.msk.f32.gmra.mxu3 %vm147_vm1, %v2544_v5  ;;  %v236_v44 = vsel %vm229_vm2, %v2613_v43, -inf }
 0x1e3   :  { %1959 = vmatpush.xpose.msk.msrb.mxu3 %vm147_vm1, %v2530_v60  ;;  %237 = vmax.xlane.f32.xlu1 %v236_v44 }
 0x1e5   :  { %v2680_v5 = vpop.permute.xlu1 %695 }
 0x1e7   :  { %1960 = vmatpush.xpose.msk.msrb.mxu3 %vm147_vm1, %v988_v45  ;;  %v214_v46 = vpop.f32.mrf.mxu1 }
 0x1e8   :  { %v215_v57 = vadd.f32 %v214_v46, %v2659_v56 }
 0x1ea   :  { %1917 = vmatmul.msk.f32.gmra.mxu3 %vm147_vm1, %v2498_v41  ;;  %v239_v60 = vsel %vm229_vm2, %v215_v57, -inf }
 0x1eb   :  { %981 = vrot.lane.b32.xlu2 %v2446_v28, %s2278_s13 }
 0x1ed   :  { %v980_v7 = vpop.permute.xlu1 %979 }
 0x1ef   :  { %v217_v47 = vpop.f32.mrf.mxu1  ;;  %699 = vrot.lane.b32.xlu0 %v2446_v28, %s2277_s12 }
 0x1f0   :  { %v218_v63 = vadd.f32 %v217_v47, %v2672_v61 }
 0x1f2   :  { %1918 = vmatmul.msk.f32.gmra.mxu3 %vm147_vm1, %v2550_v8  ;;  %v242_v2 = vsel %vm229_vm2, %v218_v63, -inf }
 0x1f7   :  { %v220_v49 = vpop.f32.mrf.mxu1 }
 0x1f8   :  { %v2637_v50 = vadd.f32 %v220_v49, %v2634_v48 }
 0x1fa   :  { %1919 = vmatmul.msk.f32.gmra.mxu3 %vm147_vm1, %v2524_v55  ;;  %v245_v41 = vsel %vm229_vm2, %v2637_v50, -inf }
 0x1fb   :  { %246 = vmax.xlane.f32.xlu1 %v245_v41 }
 0x1ff   :  { %v223_v28 = vpop.f32.mrf.mxu1 }
 0x202   :  { %1920 = vmatmul.msk.f32.gmra.mxu3 %vm147_vm1, %v422_v51 }
 0x207   :  { %v226_v53 = vpop.f32.mrf.mxu1 }
 0x208   :  { %v2650_v54 = vadd.f32 %v226_v53, %v2647_v52 }
 0x20a   :  { %1961 = vmatmul.msk.f32.vlgmr.msrb.gmra.mxu3 %vm147_vm1, %v2534_v62  ;;  %v251_v55 = vsel %vm229_vm2, %v2650_v54, -inf  ;;  %v224_v62 = vadd.f32 %v223_v28, %v2665_v59 }
 0x20b   :  { %252 = vmax.xlane.f32.xlu1 %v251_v55 }
 0x20c   :  { %v248_v0 = vsel %vm229_vm2, %v224_v62, -inf }
 0x212   :  { %1962 = vmatmul.msk.f32.gmra.mxu3 %vm147_vm1, %v974_v58 }
 0x214   :  { %240 = vmax.xlane.f32.xlu2 %v239_v60 }
 0x219   :  { %249 = vmax.xlane.f32.xlu0 %v248_v0 }
 0x21a   :  { %1963 = vmatmul.msk.f32.gmra.mxu3 %vm147_vm1, %v2546_v6  ;;  %v2688_v6 = vpop.permute.xlu1 %701 }
 0x21c   :  { %243 = vmax.xlane.f32.xlu2 %v242_v2 }
 0x222   :  { %1964 = vmatmul.msk.f32.gmra.mxu3 %vm147_vm1, %v2542_v4 }
 0x224   :  { %985 = vrot.lane.b32.xlu1 %v2491_v40, %s2278_s13 }
 0x22a   :  { %1965 = vmatmul.msk.f32.gmra.mxu3 %vm147_vm1, %v980_v7 }
 0x246   :  { %v232_v8 = vpop.xlane.xlu2 %231 }
 0x247   :  { %v254_v9 = vsub.f32 %v2575_v31, %v232_v8 }
 0x249   :  { %v262_v11 = vmul.f32 1.442695, %v254_v9 }
 0x24b   :  { %2119 = vpow2.f32 %v262_v11 }
 0x24d   :  { %v2690_v12 = vpop.f32.mrf.mxu3 }
 0x24e   :  { %v982_v13 = vpop.permute.xlu2 %981  ;;  %v235_v14 = vpop.xlane.xlu0 %234 }
 0x24f   :  { %v255_v15 = vsub.f32 %v2594_v35, %v235_v14  ;;  %1966 = vmatmul.msk.f32.gmra.mxu3 %vm147_vm1, %v982_v13 }
 0x251   :  { %v2694_v4 = vpop.eup %2119  ;;  %v264_v16 = vmul.f32 1.442695, %v255_v15 }
 0x252   :  { %v278_v17 = vsel %vm229_vm2, %v2694_v4, 0.0 }
 0x253   :  { %2121 = vpow2.f32 %v264_v16  ;;  %279 = vadd.xlane.f32.xlu2 %v278_v17 }
 0x255   :  { %v491_v18 = vpop.f32.mrf.mxu3 }
 0x256   :  { %v238_v20 = vpop.xlane.xlu1 %237  ;;  %v2737_v9 = vadd.f32 %v491_v18, %v2591_v33 }
 0x257   :  { %v256_v23 = vsub.f32 %v2613_v43, %v238_v20 }
 0x258   :  { %v515_v14 = vsel %vm229_vm2, %v2737_v9, -inf }
 0x259   :  { %v2699_v24 = vpop.eup %2121  ;;  %v266_v25 = vmul.f32 1.442695, %v256_v23 }
 0x25a   :  { %v281_v27 = vsel %vm229_vm2, %v2699_v24, 0.0 }
 0x25b   :  { %2123 = vpow2.f32 %v266_v25  ;;  %282 = vadd.xlane.f32.xlu0 %v281_v27 }
 0x25d   :  { %v494_v30 = vpop.f32.mrf.mxu3 }
 0x25e   :  { %v2704_v31 = vadd.f32 %v494_v30, %v2610_v39 }
 0x260   :  { %v518_v32 = vsel %vm229_vm2, %v2704_v31, -inf }
 0x261   :  { %v2708_v34 = vpop.eup %2123  ;;  %519 = vmax.xlane.f32.xlu1 %v518_v32  ;;  %v2721_v45 = vpop.permute.xlu0 %699 }
 0x262   :  { %v284_v35 = vsel %vm229_vm2, %v2708_v34, 0.0 }
 0x263   :  { %285 = vadd.xlane.f32.xlu2 %v284_v35 }
 0x265   :  { %v2712_v38 = vpop.f32.mrf.mxu3 }
 0x26d   :  { %v500_v42 = vpop.f32.mrf.mxu3 }
 0x26e   :  { %v2715_v43 = vadd.f32 %v500_v42, %v2672_v61  ;;  %v247_v51 = vpop.xlane.xlu1 %246 }
 0x26f   :  { %v259_v0 = vsub.f32 %v2637_v50, %v247_v51 }
 0x270   :  { %v524_v44 = vsel %vm229_vm2, %v2715_v43, -inf }
 0x271   :  { %525 = vmax.xlane.f32.xlu1 %v524_v44 }
 0x275   :  { %v503_v7 = vpop.f32.mrf.mxu3 }
 0x276   :  { %v2751_v18 = vadd.f32 %v503_v7, %v2634_v48 }
 0x278   :  { %v527_v23 = vsel %vm229_vm2, %v2751_v18, -inf }
 0x27b   :  { %703 = vrot.lane.b32.xlu2 %v2491_v40, %s2277_s12 }
 0x27d   :  { %v506_v13 = vpop.f32.mrf.mxu3 }
 0x27e   :  { %v2746_v16 = vadd.f32 %v506_v13, %v2665_v59  ;;  %v2764_v32 = vpop.xlane.xlu1 %252 }
 0x280   :  { %v530_v20 = vsel %vm229_vm2, %v2746_v16, -inf }
 0x285   :  { %v509_v17 = vpop.f32.mrf.mxu3 }
 0x287   :  { %v241_v46 = vpop.xlane.xlu2 %240 }
 0x288   :  { %v257_v47 = vsub.f32 %v215_v57, %v241_v46  ;;  %v272_v57 = vmul.f32 1.442695, %v259_v0 }
 0x28a   :  { %v268_v49 = vmul.f32 1.442695, %v257_v47 }
 0x28c   :  { %2125 = vpow2.f32 %v268_v49  ;;  %v250_v41 = vpop.xlane.xlu0 %249 }
 0x28d   :  { %v260_v28 = vsub.f32 %v224_v62, %v250_v41  ;;  %v1052_v25 = vpop.f32.mrf.mxu3 }
 0x28e   :  { %v2758_v27 = vadd.f32 %v1052_v25, %v2572_v26 }
 0x28f   :  { %v274_v53 = vmul.f32 1.442695, %v260_v28  ;;  %v244_v55 = vpop.xlane.xlu2 %243 }
 0x290   :  { %v258_v58 = vsub.f32 %v218_v63, %v244_v55  ;;  %v1076_v30 = vsel %vm229_vm2, %v2758_v27, -inf }
 0x291   :  { %2127 = vpow2.f32 %v274_v53 }
 0x292   :  { %v2723_v60 = vpop.eup %2125  ;;  %v270_v2 = vmul.f32 1.442695, %v258_v58 }
 0x293   :  { %v287_v40 = vsel %vm229_vm2, %v2723_v60, 0.0 }
 0x294   :  { %2129 = vpow2.f32 %v270_v2  ;;  %288 = vadd.xlane.f32.xlu0 %v287_v40 }
 0x295   :  { %2131 = vpow2.f32 %v272_v57  ;;  %v2768_v46 = vpop.f32.mrf.mxu3 }
 0x296   :  { %v2766_v42 = vpop.permute.xlu1 %985 }
 0x297   :  { %v2728_v8 = vpop.eup %2127 }
 0x298   :  { %v296_v62 = vsel %vm229_vm2, %v2728_v8, 0.0 }
 0x299   :  { %297 = vadd.xlane.f32.xlu1 %v296_v62 }
 0x29a   :  { %v2732_v63 = vpop.eup %2129 }
 0x29b   :  { %v290_v50 = vsel %vm229_vm2, %v2732_v63, 0.0  ;;  %v2739_v11 = vpop.eup %2131 }
 0x29c   :  { %291 = vadd.xlane.f32.xlu0 %v290_v50  ;;  %v293_v15 = vsel %vm229_vm2, %v2739_v11, 0.0 }
 0x29d   :  { %v2774_v55 = vpop.f32.mrf.mxu3 }
 0x2a4   :  { %516 = vmax.xlane.f32.xlu2 %v515_v14  ;;  %294 = vadd.xlane.f32.xlu0 %v293_v15  ;;  %v2799_v15 = vadd.f32 %v509_v17, %v2647_v52 }
 0x2ac   :  { %531 = vmax.xlane.f32.xlu2 %v530_v20 }
 0x2b2   :  { %2060 = vrot.lane.b32.xlu1 %v2481_v37, %s2279_s6 }
 0x2b4   :  { %528 = vmax.xlane.f32.xlu2 %v527_v23 }
 0x2b8   :  { %983 = vrot.lane.b32.xlu0 %v2449_v29, %s2278_s13 }
 0x2bc   :  { %1077 = vmax.xlane.f32.xlu2 %v1076_v30 }
 0x2c6   :  { %v280_v35 = vpop.xlane.xlu2 %279 }
 0x2c7   :  { %2133 = vrcp.f32 %v280_v35 }
 0x2cd   :  { %v2134_v44 = vpop.eup %2133 }
 0x2ce   :  { %v283_v47 = vpop.xlane.xlu0 %282  ;;  %v310_v49 = vmul.f32 %v2134_v44, %v2694_v4  ;;  %v2779_v4 = vadd.f32 %v2690_v12, %v2572_v26 }
 0x2cf   :  { %2135 = vrcp.f32 %v283_v47 }
 0x2d0   :  { %1897 = vmatmul.msk.f32.vlgmr.msra.gmra.mxu2 %vm229_vm2, %v310_v49  ;;  %v512_v57 = vsel %vm229_vm2, %v2779_v4, -inf }
 0x2d4   :  { %v520_v29 = vpop.xlane.xlu1 %519 }
 0x2d5   :  { %v2136_v41 = vpop.eup %2135  ;;  %v538_v28 = vsub.f32 %v2704_v31, %v520_v29  ;;  %v1061_v31 = vpop.f32.mrf.mxu3 }
 0x2d6   :  { %v286_v51 = vpop.xlane.xlu2 %285  ;;  %v311_v53 = vmul.f32 %v2136_v41, %v2699_v24  ;;  %v2790_v7 = vadd.f32 %v1061_v31, %v2659_v56 }
 0x2d7   :  { %v548_v58 = vmul.f32 1.442695, %v538_v28  ;;  %2137 = vrcp.f32 %v286_v51 }
 0x2d8   :  { %1898 = vmatmul.msk.f32.gmra.mxu2 %vm229_vm2, %v311_v53  ;;  %v1085_v13 = vsel %vm229_vm2, %v2790_v7, -inf }
 0x2d9   :  { %2139 = vpow2.f32 %v548_v58 }
 0x2dd   :  { %v2138_v0 = vpop.eup %2137 }
 0x2de   :  { %v312_v2 = vmul.f32 %v2138_v0, %v2708_v34  ;;  %v498_v34 = vadd.f32 %v2712_v38, %v2659_v56  ;;  %v533_v38 = vsel %vm229_vm2, %v2799_v15, -inf  ;;  %v2819_v0 = vadd.f32 %v2768_v46, %v2591_v33 }
 0x2df   :  { %v2782_v40 = vpop.eup %2139 }
 0x2e0   :  { %1899 = vmatmul.msk.f32.gmra.mxu2 %vm229_vm2, %v312_v2  ;;  %v566_v24 = vsel %vm229_vm2, %v2782_v40, 0.0  ;;  %v521_v14 = vsel %vm229_vm2, %v498_v34, -inf  ;;  %v2826_v2 = vadd.f32 %v2774_v55, %v2610_v39 }
 0x2e1   :  { %567 = vadd.xlane.f32.xlu1 %v566_v24  ;;  %v2832_v24 = vpop.permute.xlu2 %703 }
 0x2e2   :  { %513 = vmax.xlane.f32.xlu0 %v512_v57 }
 0x2e4   :  { %v526_v12 = vpop.xlane.xlu1 %525 }
 0x2e5   :  { %v540_v62 = vsub.f32 %v2715_v43, %v526_v12 }
 0x2e7   :  { %v552_v50 = vmul.f32 1.442695, %v540_v62 }
 0x2e9   :  { %2141 = vpow2.f32 %v552_v50  ;;  %1086 = vmax.xlane.f32.xlu1 %v1085_v13 }
 0x2ea   :  { %522 = vmax.xlane.f32.xlu0 %v521_v14 }
 0x2ef   :  { %v2801_v20 = vpop.eup %2141 }
 0x2f0   :  { %v572_v23 = vsel %vm229_vm2, %v2801_v20, 0.0 }
 0x2f1   :  { %573 = vadd.xlane.f32.xlu1 %v572_v23 }
 0x2f2   :  { %534 = vmax.xlane.f32.xlu0 %v533_v38 }
 0x306   :  { %2065 = vrot.lane.b32.xlu0 %v2408_v22, %s2279_s6 }
 0x307   :  { %v289_v43 = vpop.xlane.xlu0 %288 }
 0x308   :  { %2143 = vrcp.f32 %v289_v43 }
 0x30c   :  { %v298_v49 = vpop.xlane.xlu1 %297 }
 0x30e   :  { %v2144_v25 = vpop.eup %2143 }
 0x30f   :  { %v292_v30 = vpop.xlane.xlu0 %291  ;;  %v313_v17 = vmul.f32 %v2144_v25, %v2723_v60  ;;  %v1064_v25 = vpop.f32.mrf.mxu3 }
 0x310   :  { %2145 = vrcp.f32 %v292_v30 }
 0x311   :  { %1900 = vmatmul.msk.f32.gmra.mxu2 %vm229_vm2, %v313_v17 }
 0x316   :  { %v2146_v35 = vpop.eup %2145 }
 0x317   :  { %v295_v44 = vpop.xlane.xlu0 %294  ;;  %v314_v47 = vmul.f32 %v2146_v35, %v2732_v63  ;;  %v517_v46 = vpop.xlane.xlu2 %516 }
 0x318   :  { %2147 = vrcp.f32 %v295_v44  ;;  %v1067_v17 = vpop.f32.mrf.mxu3 }
 0x319   :  { %1901 = vmatmul.msk.f32.gmra.mxu2 %vm229_vm2, %v314_v47  ;;  %2149 = vrcp.f32 %v298_v49  ;;  %v2849_v35 = vadd.f32 %v1067_v17, %v2634_v48 }
 0x31b   :  { %v1091_v47 = vsel %vm229_vm2, %v2849_v35, -inf }
 0x31e   :  { %v2148_v29 = vpop.eup %2147 }
 0x31f   :  { %v315_v41 = vmul.f32 %v2148_v29, %v2739_v11  ;;  %v2150_v28 = vpop.eup %2149  ;;  %v1079_v11 = vsel %vm229_vm2, %v2819_v0, -inf  ;;  %v532_v62 = vpop.xlane.xlu2 %531 }
 0x320   :  { %v316_v53 = vmul.f32 %v2150_v28, %v2728_v8  ;;  %v1082_v8 = vsel %vm229_vm2, %v2826_v2, -inf  ;;  %v542_v14 = vsub.f32 %v2746_v16, %v532_v62 }
 0x321   :  { %1902 = vmatmul.msk.f32.gmra.mxu2 %vm229_vm2, %v315_v41  ;;  %v261_v41 = vsub.f32 %v2650_v54, %v2764_v32  ;;  %v537_v32 = vsub.f32 %v2737_v9, %v517_v46 }
 0x322   :  { %v556_v38 = vmul.f32 1.442695, %v542_v14 }
 0x323   :  { %v276_v28 = vmul.f32 1.442695, %v261_v41 }
 0x324   :  { %v2061_v51 = vpop.permute.xlu1 %2060 }
 0x325   :  { %v2062_v60 = vunpack.i.l.bf16 %v2061_v51  ;;  %v2063_v58 = vunpack.i.h.bf16 %v2061_v51 }
 0x327   :  { %656 = vmatpush.msrb.mxu0 %v2062_v60  ;;  %2009 = vmatpush.msrb.mxu1 %v2062_v60 }
 0x329   :  { %1903 = vmatmul.msk.f32.gmra.mxu2 %vm229_vm2, %v316_v53  ;;  %657 = vmatpush.msrb.mxu0 %v2063_v58 }
 0x32a   :  { %2010 = vmatpush.msrb.mxu1 %v2063_v58  ;;  %v984_v63 = vpop.permute.xlu0 %983 }
 0x32b   :  { %1967 = vmatmul.msk.f32.gmra.mxu3 %vm147_vm1, %v984_v63 }
 0x330   :  { %1080 = vmax.xlane.f32.xlu0 %v1079_v11  ;;  %v529_v11 = vpop.xlane.xlu2 %528 }
 0x333   :  { %1968 = vmatmul.msk.f32.gmra.mxu3 %vm147_vm1, %v2766_v42 }
 0x338   :  { %1083 = vmax.xlane.f32.xlu0 %v1082_v8  ;;  %v2869_v54 = vpop.xlane.xlu2 %1077 }
 0x355   :  { %v514_v31 = vpop.xlane.xlu0 %513 }
 0x356   :  { %v536_v57 = vsub.f32 %v2779_v4, %v514_v31 }
 0x358   :  { %v544_v12 = vmul.f32 1.442695, %v536_v57  ;;  %v546_v57 = vmul.f32 1.442695, %v537_v32 }
 0x35a   :  { %2151 = vpow2.f32 %v544_v12 }
 0x35d   :  { %v523_v50 = vpop.xlane.xlu0 %522 }
 0x35e   :  { %v539_v13 = vsub.f32 %v498_v34, %v523_v50 }
 0x360   :  { %v2835_v55 = vpop.eup %2151  ;;  %v550_v42 = vmul.f32 1.442695, %v539_v13 }
 0x361   :  { %v560_v23 = vsel %vm229_vm2, %v2835_v55, 0.0 }
 0x362   :  { %2153 = vpow2.f32 %v550_v42  ;;  %561 = vadd.xlane.f32.xlu2 %v560_v23  ;;  %v541_v42 = vsub.f32 %v2751_v18, %v529_v11 }
 0x363   :  { %2155 = vpow2.f32 %v556_v38 }
 0x364   :  { %2157 = vpow2.f32 %v276_v28  ;;  %v554_v38 = vmul.f32 1.442695, %v541_v42 }
 0x365   :  { %v535_v30 = vpop.xlane.xlu0 %534  ;;  %2159 = vpow2.f32 %v546_v57 }
 0x366   :  { %v543_v9 = vsub.f32 %v2799_v15, %v535_v30  ;;  %2161 = vpow2.f32 %v554_v38 }
 0x368   :  { %v2840_v43 = vpop.eup %2153 }
 0x369   :  { %v569_v4 = vsel %vm229_vm2, %v2840_v43, 0.0  ;;  %v2844_v34 = vpop.eup %2155 }
 0x36a   :  { %570 = vadd.xlane.f32.xlu0 %v569_v4  ;;  %v578_v16 = vsel %vm229_vm2, %v2844_v34, 0.0  ;;  %v2158_v51 = vpop.eup %2157  ;;  %v2885_v4 = vadd.f32 %v1064_v25, %v2672_v61 }
 0x36b   :  { %v299_v60 = vsel %vm229_vm2, %v2158_v51, 0.0  ;;  %v2876_v13 = vpop.eup %2159 }
 0x36c   :  { %v563_v46 = vsel %vm229_vm2, %v2876_v13, 0.0  ;;  %v1088_v18 = vsel %vm229_vm2, %v2885_v4, -inf }
 0x372   :  { %579 = vadd.xlane.f32.xlu0 %v578_v16  ;;  %v558_v16 = vmul.f32 1.442695, %v543_v9 }
 0x374   :  { %2163 = vpow2.f32 %v558_v16 }
 0x378   :  { %v2066_v44 = vpop.permute.xlu0 %2065 }
 0x379   :  { %v2067_v49 = vunpack.i.l.bf16 %v2066_v44  ;;  %v2068_v29 = vunpack.i.h.bf16 %v2066_v44  ;;  %v2889_v44 = vpop.eup %2161 }
 0x37a   :  { %2070 = vrot.lane.b32.xlu2 %v2396_v21, %s2279_s6  ;;  %1092 = vmax.xlane.f32.xlu0 %v1091_v47  ;;  %v2891_v15 = vpop.eup %2163  ;;  %v575_v30 = vsel %vm229_vm2, %v2889_v44, 0.0 }
 0x37b   :  { %658 = vmatpush.msrb.mxu0 %v2067_v49  ;;  %2011 = vmatpush.msrb.mxu1 %v2067_v49  ;;  %v581_v25 = vsel %vm229_vm2, %v2891_v15, 0.0 }
 0x37d   :  { %659 = vmatpush.msrb.mxu0 %v2068_v29  ;;  %2012 = vmatpush.msrb.mxu1 %v2068_v29 }
 0x38e   :  { %2080 = vrot.lane.b32.xlu0 %v2481_v37, %s2280_s29 }
 0x3a3   :  { %300 = vadd.xlane.f32.xlu2 %v299_v60  ;;  %v2872_v8 = vpop.xlane.xlu0 %1080  ;;  %v568_v60 = vpop.xlane.xlu1 %567 }
 0x3ab   :  { %v2874_v12 = vpop.xlane.xlu0 %1083  ;;  %v2906_v42 = vpop.xlane.xlu1 %1086 }
 0x3ae   :  { %v1070_v53 = vpop.f32.mrf.mxu3 }
 0x3af   :  { %v2861_v58 = vadd.f32 %v1070_v53, %v2665_v59 }
 0x3b1   :  { %v1094_v63 = vsel %vm229_vm2, %v2861_v58, -inf }
 0x3b2   :  { %1095 = vmax.xlane.f32.xlu1 %v1094_v63 }
 0x3bb   :  { %2075 = vrot.lane.b32.xlu2 %v2388_v19, %s2279_s6 }
 0x3cb   :  { %2090 = vrot.lane.b32.xlu1 %v2408_v22, %s2280_s29 }
 0x3d5   :  { %v562_v31 = vpop.xlane.xlu2 %561 }
 0x3dd   :  { %v2071_v62 = vpop.permute.xlu2 %2070  ;;  %v2882_v23 = vpop.xlane.xlu0 %570 }
 0x3de   :  { %v2072_v50 = vunpack.i.l.bf16 %v2071_v62  ;;  %v2073_v14 = vunpack.i.h.bf16 %v2071_v62 }
 0x3e0   :  { %660 = vmatpush.msrb.mxu0 %v2072_v50  ;;  %2013 = vmatpush.msrb.mxu1 %v2072_v50 }
 0x3e2   :  { %661 = vmatpush.msrb.mxu0 %v2073_v14  ;;  %2014 = vmatpush.msrb.mxu1 %v2073_v14 }
 0x3e4   :  { %564 = vadd.xlane.f32.xlu2 %v563_v46  ;;  %v2931_v46 = vpop.f32.mrf.mxu2 }
 0x3e5   :  { %v580_v17 = vpop.xlane.xlu0 %579 }
 0x3ec   :  { %1089 = vmax.xlane.f32.xlu2 %v1088_v18  ;;  %v2937_v16 = vpop.f32.mrf.mxu2 }
 0x3ed   :  { %v2897_v47 = vpop.xlane.xlu0 %1092 }
 0x3f4   :  { %576 = vadd.xlane.f32.xlu2 %v575_v30 }
 0x3f5   :  { %582 = vadd.xlane.f32.xlu1 %v581_v25 }
 0x400   :  { %v2081_v49 = vpop.permute.xlu0 %2080 }
 0x401   :  { %v2082_v29 = vunpack.i.l.bf16 %v2081_v49  ;;  %v2083_v41 = vunpack.i.h.bf16 %v2081_v49  ;;  %v2943_v49 = vpop.f32.mrf.mxu2 }
 0x403   :  { %2017 = vmatpush.msra.mxu2 %v2082_v29 }
 0x405   :  { %2018 = vmatpush.msra.mxu2 %v2083_v41 }
 0x40c   :  { %2085 = vrot.lane.b32.xlu2 %v2481_v37, %s2281_s30 }
 0x414   :  { %2105 = vrot.lane.b32.xlu2 %v2396_v21, %s2281_s30 }
 0x416   :  { %v301_v28 = vpop.xlane.xlu2 %300 }
 0x417   :  { %2165 = vrcp.f32 %v301_v28 }
 0x418   :  { %2167 = vrcp.f32 %v562_v31 }
 0x419   :  { %2169 = vrcp.f32 %v580_v17 }
 0x41d   :  { %v2166_v53 = vpop.eup %2165 }
 0x41e   :  { %v2168_v63 = vpop.eup %2167  ;;  %v2076_v11 = vpop.permute.xlu2 %2075  ;;  %v317_v32 = vmul.f32 %v2166_v53, %v2158_v51 }
 0x41f   :  { %v2170_v57 = vpop.eup %2169  ;;  %v2077_v62 = vunpack.i.l.bf16 %v2076_v11  ;;  %v2078_v50 = vunpack.i.h.bf16 %v2076_v11  ;;  %v592_v37 = vmul.f32 %v2168_v63, %v2835_v55  ;;  %v574_v51 = vpop.xlane.xlu1 %573 }
 0x420   :  { %1904 = vmatmul.msk.f32.gmra.mxu2 %vm229_vm2, %v317_v32  ;;  %v598_v14 = vmul.f32 %v2170_v57, %v2844_v34 }
 0x421   :  { %662 = vmatpush.msrb.mxu0 %v2077_v62  ;;  %2015 = vmatpush.msrb.mxu1 %v2077_v62 }
 0x423   :  { %663 = vmatpush.msrb.mxu0 %v2078_v50  ;;  %2016 = vmatpush.msrb.mxu1 %v2078_v50 }
 0x424   :  { %1921 = vmatmul.msk.f32.vlgmr.msrb.gmra.mxu0 %vm229_vm2, %v592_v37  ;;  %1927 = vmatmul.msk.f32.vlgmr.msrb.gmra.mxu1 %vm229_vm2, %v598_v14 }
 0x425   :  { %938 = vmatpush.msra.mxu1 %v2082_v29 }
 0x427   :  { %939 = vmatpush.msra.mxu1 %v2083_v41  ;;  %v2914_v55 = vpop.xlane.xlu1 %1095 }
 0x428   :  { %1937 = vmatmul.msk.f32.vlgmr.msrb.gmra.mxu2 %vm147_vm1, %v2598_v36 }
 0x430   :  { %1938 = vmatmul.msk.f32.gmra.mxu2 %vm147_vm1, %v2540_v3 }
 0x438   :  { %1939 = vmatmul.msk.f32.gmra.mxu2 %vm147_vm1, %v2538_v1 }
 0x43d   :  { %v2091_v34 = vpop.permute.xlu1 %2090 }
 0x43e   :  { %v2092_v31 = vunpack.i.l.bf16 %v2091_v34  ;;  %v2093_v9 = vunpack.i.h.bf16 %v2091_v34 }
 0x440   :  { %1940 = vmatmul.msk.f32.gmra.mxu2 %vm147_vm1, %v2680_v5  ;;  %940 = vmatpush.msra.mxu1 %v2092_v31 }
 0x441   :  { %2019 = vmatpush.msra.mxu2 %v2092_v31 }
 0x442   :  { %941 = vmatpush.msra.mxu1 %v2093_v9 }
 0x443   :  { %2020 = vmatpush.msra.mxu2 %v2093_v9 }
 0x448   :  { %1941 = vmatmul.msk.f32.gmra.mxu2 %vm147_vm1, %v2552_v10 }
 0x450   :  { %1942 = vmatmul.msk.f32.gmra.mxu2 %vm147_vm1, %v2721_v45 }
 0x457   :  { %v565_v3 = vpop.xlane.xlu2 %564 }
 0x458   :  { %2171 = vrcp.f32 %v565_v3  ;;  %1943 = vmatmul.msk.f32.gmra.mxu2 %vm147_vm1, %v2688_v6  ;;  %v1100_v3 = vsub.f32 %v2758_v27, %v2869_v54  ;;  %v1073_v27 = vpop.f32.mrf.mxu3 }
 0x459   :  { %2173 = vrcp.f32 %v568_v60 }
 0x45a   :  { %2175 = vrcp.f32 %v2882_v23 }
 0x45e   :  { %v2172_v1 = vpop.eup %2171 }
 0x45f   :  { %v2926_v36 = vpop.xlane.xlu2 %1089  ;;  %v593_v5 = vmul.f32 %v2172_v1, %v2876_v13  ;;  %v2174_v10 = vpop.eup %2173  ;;  %v1108_v1 = vmul.f32 1.442695, %v1100_v3 }
 0x460   :  { %1944 = vmatmul.msk.f32.gmra.mxu2 %vm147_vm1, %v2832_v24  ;;  %v594_v38 = vmul.f32 %v2174_v10, %v2782_v40  ;;  %v2176_v13 = vpop.eup %2175 }
 0x461   :  { %1922 = vmatmul.msk.f32.gmra.mxu0 %vm229_vm2, %v593_v5  ;;  %v595_v17 = vmul.f32 %v2176_v13, %v2840_v43  ;;  %v2947_v43 = vpop.f32.mrf.mxu2 }
 0x467   :  { %v577_v45 = vpop.xlane.xlu2 %576 }
 0x468   :  { %v583_v6 = vpop.xlane.xlu1 %582 }
 0x469   :  { %2177 = vrcp.f32 %v583_v6  ;;  %1923 = vmatmul.msk.f32.gmra.mxu0 %vm229_vm2, %v594_v38  ;;  %v2951_v28 = vpop.f32.mrf.mxu2  ;;  %v1101_v38 = vsub.f32 %v2819_v0, %v2872_v8  ;;  %v3009_v6 = vadd.f32 %v1073_v27, %v2647_v52 }
 0x46a   :  { %2179 = vrcp.f32 %v574_v51 }
 0x46b   :  { %2181 = vrcp.f32 %v577_v45 }
 0x46c   :  { %2183 = vpow2.f32 %v1108_v1 }
 0x46f   :  { %v2178_v18 = vpop.eup %2177  ;;  %v2086_v24 = vpop.permute.xlu2 %2085 }
 0x470   :  { %v2087_v30 = vunpack.i.l.bf16 %v2086_v24  ;;  %v599_v25 = vmul.f32 %v2178_v18, %v2891_v15  ;;  %v2088_v23 = vunpack.i.h.bf16 %v2086_v24  ;;  %v2180_v40 = vpop.eup %2179  ;;  %v1097_v18 = vsel %vm229_vm2, %v3009_v6, -inf }
 0x471   :  { %1924 = vmatmul.msk.f32.gmra.mxu0 %vm229_vm2, %v595_v17  ;;  %v596_v29 = vmul.f32 %v2180_v40, %v2801_v20  ;;  %v2182_v41 = vpop.eup %2181  ;;  %v2953_v60 = vpop.f32.mrf.mxu2  ;;  %v1105_v17 = vsub.f32 %v2849_v35, %v2897_v47 }
 0x472   :  { %1928 = vmatmul.msk.f32.gmra.mxu1 %vm229_vm2, %v599_v25  ;;  %1220 = vmatpush.msra.mxu0 %v2087_v30  ;;  %v597_v15 = vmul.f32 %v2182_v41, %v2889_v44  ;;  %v3004_v54 = vpop.eup %2183 }
 0x473   :  { %v1124_v13 = vsel %vm229_vm2, %v3004_v54, 0.0 }
 0x474   :  { %1221 = vmatpush.msra.mxu0 %v2088_v23  ;;  %v1106_v23 = vsub.f32 %v2861_v58, %v2914_v55 }
 0x476   :  { %v1120_v47 = vmul.f32 1.442695, %v1106_v23 }
 0x477   :  { %v2106_v3 = vpop.permute.xlu2 %2105 }
 0x479   :  { %1925 = vmatmul.msk.f32.gmra.mxu0 %vm229_vm2, %v596_v29  ;;  %v2955_v53 = vpop.f32.mrf.mxu2 }
 0x481   :  { %1926 = vmatmul.msk.f32.gmra.mxu0 %vm229_vm2, %v597_v15 }
 0x4a3   :  { %v2957_v63 = vpop.f32.mrf.mxu2 }
 0x4ab   :  { %v770_v11 = vpop.f32.mrf.mxu2 }
 0x4ac   :  { %v2960_v20 = vadd.f32 %v770_v11, %v2572_v26 }
 0x4ae   :  { %v794_v32 = vsel %vm229_vm2, %v2960_v20, -inf }
 0x4af   :  { %795 = vmax.xlane.f32.xlu0 %v794_v32 }
 0x4b3   :  { %v773_v57 = vpop.f32.mrf.mxu2 }
 0x4b4   :  { %v2965_v44 = vadd.f32 %v773_v57, %v2591_v33 }
 0x4b6   :  { %v797_v62 = vsel %vm229_vm2, %v2965_v44, -inf }
 0x4b7   :  { %798 = vmax.xlane.f32.xlu1 %v797_v62 }
 0x4bb   :  { %v776_v50 = vpop.f32.mrf.mxu2 }
 0x4bc   :  { %v2970_v37 = vadd.f32 %v776_v50, %v2610_v39  ;;  %v1102_v50 = vsub.f32 %v2826_v2, %v2874_v12 }
 0x4be   :  { %v800_v26 = vsel %vm229_vm2, %v2970_v37, -inf }
 0x4bf   :  { %801 = vmax.xlane.f32.xlu1 %v800_v26 }
 0x4c3   :  { %v779_v14 = vpop.f32.mrf.mxu2 }
 0x4c4   :  { %v2975_v51 = vadd.f32 %v779_v14, %v2659_v56  ;;  %v1112_v14 = vmul.f32 1.442695, %v1102_v50 }
 0x4c6   :  { %v803_v33 = vsel %vm229_vm2, %v2975_v51, -inf }
 0x4c7   :  { %804 = vmax.xlane.f32.xlu0 %v803_v33 }
 0x4cb   :  { %v782_v34 = vpop.f32.mrf.mxu2 }
 0x4d3   :  { %v785_v31 = vpop.f32.mrf.mxu2 }
 0x4d4   :  { %v2980_v9 = vadd.f32 %v785_v31, %v2634_v48  ;;  %v2993_v48 = vadd.f32 %v782_v34, %v2672_v61 }
 0x4d6   :  { %v809_v39 = vsel %vm229_vm2, %v2980_v9, -inf }
 0x4d7   :  { %810 = vmax.xlane.f32.xlu2 %v809_v39 }
 0x4d8   :  { %2095 = vrot.lane.b32.xlu1 %v2408_v22, %s2281_s30  ;;  %v806_v22 = vsel %vm229_vm2, %v2993_v48, -inf }
 0x4db   :  { %2100 = vrot.lane.b32.xlu0 %v2396_v21, %s2280_s29  ;;  %v788_v56 = vpop.f32.mrf.mxu2  ;;  %v1103_v21 = vsub.f32 %v2790_v7, %v2906_v42  ;;  %v1104_v7 = vsub.f32 %v2885_v4, %v2926_v36  ;;  %v1110_v42 = vmul.f32 1.442695, %v1101_v38 }
 0x4dc   :  { %v3018_v24 = vadd.f32 %v788_v56, %v2665_v59  ;;  %v1118_v59 = vmul.f32 1.442695, %v1105_v17  ;;  %v665_v56 = vpop.f32.mrf.mxu0 }
 0x4dd   :  { %v1114_v61 = vmul.f32 1.442695, %v1103_v21  ;;  %v1116_v0 = vmul.f32 1.442695, %v1104_v7  ;;  %v2107_v7 = vunpack.i.l.bf16 %v2106_v3 }
 0x4de   :  { %v812_v8 = vsel %vm229_vm2, %v3018_v24, -inf }
 0x4df   :  { %2185 = vpow2.f32 %v1114_v61 }
 0x4e0   :  { %2187 = vpow2.f32 %v1110_v42 }
 0x4e1   :  { %2189 = vpow2.f32 %v1116_v0 }
 0x4e2   :  { %2191 = vpow2.f32 %v1118_v59 }
 0x4e3   :  { %v791_v5 = vpop.f32.mrf.mxu2  ;;  %2193 = vpow2.f32 %v1120_v47 }
 0x4e4   :  { %v2996_v10 = vadd.f32 %v791_v5, %v2647_v52 }
 0x4e5   :  { %v3020_v52 = vpop.eup %2185 }
 0x4e6   :  { %v815_v45 = vsel %vm229_vm2, %v2996_v10, -inf  ;;  %v1133_v4 = vsel %vm229_vm2, %v3020_v52, 0.0  ;;  %v3028_v36 = vpop.eup %2187 }
 0x4e7   :  { %v3030_v30 = vpop.eup %2189  ;;  %v1127_v25 = vsel %vm229_vm2, %v3028_v36, 0.0 }
 0x4e8   :  { %v1136_v35 = vsel %vm229_vm2, %v3030_v30, 0.0  ;;  %v3038_v40 = vpop.eup %2191 }
 0x4e9   :  { %v1139_v15 = vsel %vm229_vm2, %v3038_v40, 0.0  ;;  %v3043_v32 = vpop.eup %2193 }
 0x4ea   :  { %v1142_v57 = vsel %vm229_vm2, %v3043_v32, 0.0 }
 0x4ef   :  { %2110 = vrot.lane.b32.xlu2 %v2388_v19, %s2280_s29 }
 0x502   :  { %807 = vmax.xlane.f32.xlu1 %v806_v22 }
 0x505   :  { %816 = vmax.xlane.f32.xlu0 %v815_v45 }
 0x50a   :  { %1125 = vadd.xlane.f32.xlu1 %v1124_v13 }
 0x50d   :  { %1098 = vmax.xlane.f32.xlu0 %v1097_v18  ;;  %v2108_v18 = vunpack.i.h.bf16 %v2106_v3 }
 0x512   :  { %813 = vmax.xlane.f32.xlu1 %v812_v8 }
 0x515   :  { %1134 = vadd.xlane.f32.xlu0 %v1133_v4 }
 0x51a   :  { %1128 = vadd.xlane.f32.xlu1 %v1127_v25 }
 0x51d   :  { %1137 = vadd.xlane.f32.xlu0 %v1136_v35 }
 0x522   :  { %v796_v29 = vpop.xlane.xlu0 %795 }
 0x523   :  { %v818_v41 = vsub.f32 %v2960_v20, %v796_v29 }
 0x525   :  { %v826_v11 = vmul.f32 1.442695, %v818_v41  ;;  %1140 = vadd.xlane.f32.xlu0 %v1139_v15 }
 0x527   :  { %2195 = vpow2.f32 %v826_v11 }
 0x52a   :  { %v799_v58 = vpop.xlane.xlu1 %798 }
 0x52b   :  { %v819_v55 = vsub.f32 %v2965_v44, %v799_v58 }
 0x52d   :  { %v3048_v62 = vpop.eup %2195  ;;  %v828_v20 = vmul.f32 1.442695, %v819_v55  ;;  %1143 = vadd.xlane.f32.xlu0 %v1142_v57 }
 0x52e   :  { %v842_v26 = vsel %vm229_vm2, %v3048_v62, 0.0 }
 0x52f   :  { %2197 = vpow2.f32 %v828_v20  ;;  %843 = vadd.xlane.f32.xlu2 %v842_v26 }
 0x530   :  { %2199 = vpow2.f32 %v1112_v14 }
 0x532   :  { %v802_v1 = vpop.xlane.xlu1 %801 }
 0x533   :  { %v820_v17 = vsub.f32 %v2970_v37, %v802_v1 }
 0x535   :  { %v3054_v33 = vpop.eup %2197  ;;  %v830_v4 = vmul.f32 1.442695, %v820_v17 }
 0x536   :  { %v845_v44 = vsel %vm229_vm2, %v3054_v33, 0.0  ;;  %v3058_v31 = vpop.eup %2199 }
 0x537   :  { %846 = vadd.xlane.f32.xlu1 %v845_v44  ;;  %v1130_v39 = vsel %vm229_vm2, %v3058_v31, 0.0 }
 0x53a   :  { %v805_v34 = vpop.xlane.xlu0 %804 }
 0x53b   :  { %v821_v2 = vsub.f32 %v2975_v51, %v805_v34  ;;  %v668_v51 = vpop.f32.mrf.mxu0 }
 0x53d   :  { %v832_v12 = vmul.f32 1.442695, %v821_v2 }
 0x53f   :  { %2201 = vpow2.f32 %v832_v12  ;;  %1131 = vadd.xlane.f32.xlu1 %v1130_v39 }
 0x540   :  { %2203 = vpow2.f32 %v830_v4 }
 0x541   :  { %1261 = vrot.lane.b32.xlu0 %v665_v56, %s2282_s9 }
 0x545   :  { %v3064_v5 = vpop.eup %2201 }
 0x546   :  { %v851_v22 = vsel %vm229_vm2, %v3064_v5, 0.0  ;;  %v3072_v59 = vpop.eup %2203 }
 0x547   :  { %2115 = vrot.lane.b32.xlu2 %v2388_v19, %s2281_s30  ;;  %852 = vadd.xlane.f32.xlu1 %v851_v22  ;;  %v848_v25 = vsel %vm229_vm2, %v3072_v59, 0.0 }
 0x549   :  { %1263 = vrot.lane.b32.xlu0 %v668_v51, %s2282_s9 }
 0x54a   :  { %v811_v21 = vpop.xlane.xlu2 %810  ;;  %v2096_v45 = vpop.permute.xlu1 %2095 }
 0x54b   :  { %v2097_v27 = vunpack.i.l.bf16 %v2096_v45  ;;  %v2098_v61 = vunpack.i.h.bf16 %v2096_v45  ;;  %v823_v47 = vsub.f32 %v2980_v9, %v811_v21 }
 0x54d   :  { %v2101_v38 = vpop.permute.xlu0 %2100  ;;  %1222 = vmatpush.msra.mxu0 %v2097_v27  ;;  %v836_v37 = vmul.f32 1.442695, %v823_v47 }
 0x54e   :  { %v2102_v13 = vunpack.i.l.bf16 %v2101_v38  ;;  %v2103_v42 = vunpack.i.h.bf16 %v2101_v38 }
 0x54f   :  { %1223 = vmatpush.msra.mxu0 %v2098_v61 }
 0x550   :  { %942 = vmatpush.msra.mxu1 %v2102_v13  ;;  %2021 = vmatpush.msra.mxu2 %v2102_v13 }
 0x551   :  { %1224 = vmatpush.msra.mxu0 %v2107_v7 }
 0x552   :  { %v2111_v0 = vpop.permute.xlu2 %2110  ;;  %943 = vmatpush.msra.mxu1 %v2103_v42  ;;  %2022 = vmatpush.msra.mxu2 %v2103_v42 }
 0x553   :  { %v2112_v19 = vunpack.i.l.bf16 %v2111_v0  ;;  %1225 = vmatpush.msra.mxu0 %v2108_v18  ;;  %v2113_v8 = vunpack.i.h.bf16 %v2111_v0 }
 0x555   :  { %944 = vmatpush.msra.mxu1 %v2112_v19  ;;  %2023 = vmatpush.msra.mxu2 %v2112_v19 }
 0x557   :  { %945 = vmatpush.msra.mxu1 %v2113_v8  ;;  %2024 = vmatpush.msra.mxu2 %v2113_v8 }
 0x570   :  { %849 = vadd.xlane.f32.xlu2 %v848_v25 }
 0x575   :  { %v808_v23 = vpop.xlane.xlu1 %807 }
 0x576   :  { %v822_v35 = vsub.f32 %v2993_v48, %v808_v23 }
 0x578   :  { %v834_v29 = vmul.f32 1.442695, %v822_v35  ;;  %v817_v41 = vpop.xlane.xlu0 %816 }
 0x579   :  { %v825_v15 = vsub.f32 %v2996_v10, %v817_v41 }
 0x57a   :  { %2205 = vpow2.f32 %v834_v29 }
 0x57b   :  { %v840_v11 = vmul.f32 1.442695, %v825_v15 }
 0x57d   :  { %2207 = vpow2.f32 %v840_v11  ;;  %v1126_v58 = vpop.xlane.xlu1 %1125 }
 0x57e   :  { %2209 = vpow2.f32 %v836_v37 }
 0x580   :  { %v3079_v55 = vpop.eup %2205  ;;  %v1099_v48 = vpop.xlane.xlu0 %1098 }
 0x581   :  { %v854_v57 = vsel %vm229_vm2, %v3079_v55, 0.0  ;;  %v1107_v14 = vsub.f32 %v3009_v6, %v1099_v48 }
 0x582   :  { %855 = vadd.xlane.f32.xlu1 %v854_v57 }
 0x583   :  { %v3083_v50 = vpop.eup %2207  ;;  %v1122_v2 = vmul.f32 1.442695, %v1107_v14  ;;  %v671_v14 = vpop.f32.mrf.mxu0 }
 0x584   :  { %v863_v9 = vsel %vm229_vm2, %v3083_v50, 0.0  ;;  %v3087_v20 = vpop.eup %2209 }
 0x585   :  { %864 = vadd.xlane.f32.xlu2 %v863_v9  ;;  %v814_v10 = vpop.xlane.xlu1 %813  ;;  %v857_v34 = vsel %vm229_vm2, %v3087_v20, 0.0 }
 0x586   :  { %v824_v26 = vsub.f32 %v3018_v24, %v814_v10 }
 0x588   :  { %v838_v44 = vmul.f32 1.442695, %v824_v26  ;;  %v1135_v18 = vpop.xlane.xlu0 %1134 }
 0x58a   :  { %2211 = vpow2.f32 %v838_v44  ;;  %858 = vadd.xlane.f32.xlu1 %v857_v34 }
 0x58b   :  { %2213 = vpow2.f32 %v1122_v2  ;;  %v674_v2 = vpop.f32.mrf.mxu0 }
 0x58d   :  { %v1129_v6 = vpop.xlane.xlu1 %1128 }
 0x590   :  { %v3093_v12 = vpop.eup %2211  ;;  %v1138_v8 = vpop.xlane.xlu0 %1137 }
 0x591   :  { %v860_v39 = vsel %vm229_vm2, %v3093_v12, 0.0  ;;  %v3097_v56 = vpop.eup %2213 }
 0x592   :  { %861 = vadd.xlane.f32.xlu1 %v860_v39  ;;  %v1145_v24 = vsel %vm229_vm2, %v3097_v56, 0.0 }
 0x598   :  { %v1141_v4 = vpop.xlane.xlu0 %1140 }
 0x59a   :  { %1146 = vadd.xlane.f32.xlu1 %v1145_v24  ;;  %v683_v24 = vpop.f32.mrf.mxu1 }
 0x5a0   :  { %v1144_v23 = vpop.xlane.xlu0 %1143 }
 0x5a2   :  { %v844_v3 = vpop.xlane.xlu2 %843 }
 0x5a3   :  { %2215 = vrcp.f32 %v844_v3 }
 0x5a4   :  { %2217 = vrcp.f32 %v1126_v58 }
 0x5a9   :  { %v2216_v1 = vpop.eup %2215 }
 0x5aa   :  { %v874_v22 = vmul.f32 %v2216_v1, %v3048_v62  ;;  %v2116_v51 = vpop.permute.xlu2 %2115  ;;  %v847_v21 = vpop.xlane.xlu1 %846 }
 0x5ab   :  { %v2218_v45 = vpop.eup %2217  ;;  %v2117_v27 = vunpack.i.l.bf16 %v2116_v51  ;;  %2219 = vrcp.f32 %v847_v21  ;;  %v2118_v61 = vunpack.i.h.bf16 %v2116_v51 }
 0x5ac   :  { %1945 = vmatmul.msk.f32.vlgmr.msra.gmra.mxu1 %vm229_vm2, %v874_v22  ;;  %2221 = vrcp.f32 %v1129_v6  ;;  %v1156_v38 = vmul.f32 %v2218_v45, %v3004_v54  ;;  %v677_v6 = vpop.f32.mrf.mxu0 }
 0x5ad   :  { %1226 = vmatpush.msra.mxu0 %v2117_v27 }
 0x5af   :  { %1227 = vmatpush.msra.mxu0 %v2118_v61 }
 0x5b0   :  { %1969 = vmatmul.msk.f32.vlgmr.msra.gmra.mxu0 %vm229_vm2, %v1156_v38 }
 0x5b1   :  { %v2220_v13 = vpop.eup %2219 }
 0x5b2   :  { %v1132_v7 = vpop.xlane.xlu1 %1131  ;;  %v875_v42 = vmul.f32 %v2220_v13, %v3054_v33  ;;  %v2222_v62 = vpop.eup %2221 }
 0x5b3   :  { %2223 = vrcp.f32 %v1132_v7  ;;  %v1157_v0 = vmul.f32 %v2222_v62, %v3028_v36  ;;  %v1378_v7 = vld [vmem:[%s3430_s2 + $0x18] sm:$0xff]  ;;  %v1376_v62 = vld [vmem:[%s3430_s2 + $0x8] sm:$0xff] }
 0x5b4   :  { %1946 = vmatmul.msk.f32.gmra.mxu1 %vm229_vm2, %v875_v42  ;;  %2225 = vrcp.f32 %v1135_v18  ;;  %v680_v3 = vpop.f32.mrf.mxu0  ;;  %v1377_v42 = vld [vmem:[%s3430_s2 + $0x10] sm:$0xff]  ;;  %1415 = vmatpush.msrb.mxu2 %v1378_v7 }
 0x5b5   :  { %2227 = vrcp.f32 %v1138_v8 }
 0x5b6   :  { %2229 = vrcp.f32 %v1141_v4  ;;  %1416 = vmatpush.msrb.mxu2 %v1377_v42  ;;  %v2264_v42 = vld [vmem:[%s3428_s0 + $0x8] sm:$0xff] }
 0x5b7   :  { %2231 = vrcp.f32 %v1144_v23 }
 0x5b8   :  { %1970 = vmatmul.msk.f32.gmra.mxu0 %vm229_vm2, %v1157_v0  ;;  %1417 = vmatpush.msrb.mxu2 %v1376_v62  ;;  %v1375_v0 = vld [vmem:[%s3430_s2] sm:$0xff] }
 0x5b9   :  { %v2224_v19 = vpop.eup %2223 }
 0x5ba   :  { %v1158_v54 = vmul.f32 %v2224_v19, %v3058_v31  ;;  %v2226_v17 = vpop.eup %2225  ;;  %v853_v41 = vpop.xlane.xlu1 %852  ;;  %1418 = vmatpush.msrb.mxu2 %v1375_v0  ;;  %v2265_v0 = vld [vmem:[%s3428_s0 + $0x10] sm:$0xff] }
 0x5bb   :  { %v1159_v33 = vmul.f32 %v2226_v17, %v3020_v52  ;;  %v2228_v25 = vpop.eup %2227 }
 0x5bc   :  { %v1160_v36 = vmul.f32 %v2228_v25, %v3030_v30  ;;  %v2230_v35 = vpop.eup %2229 }
 0x5bd   :  { %v1161_v31 = vmul.f32 %v2230_v35, %v3038_v40  ;;  %v2232_v47 = vpop.eup %2231 }
 0x5be   :  { %v1162_v29 = vmul.f32 %v2232_v47, %v3043_v32 }
 0x5c0   :  { %1971 = vmatmul.msk.f32.gmra.mxu0 %vm229_vm2, %v1158_v54 }
 0x5c8   :  { %1972 = vmatmul.msk.f32.gmra.mxu0 %vm229_vm2, %v1159_v33  ;;  %v1262_v33 = vpop.permute.xlu0 %1261 }
 0x5c9   :  { %v1349_v25 = vsel %vm147_vm1, %v2931_v46, %v1262_v33 }
 0x5d0   :  { %1973 = vmatmul.msk.f32.gmra.mxu0 %vm229_vm2, %v1160_v36  ;;  %v1264_v36 = vpop.permute.xlu0 %1263 }
 0x5d8   :  { %1974 = vmatmul.msk.f32.gmra.mxu0 %vm229_vm2, %v1161_v31 }
 0x5e0   :  { %1975 = vmatmul.msk.f32.gmra.mxu0 %vm229_vm2, %v1162_v29  ;;  %v1350_v29 = vsel %vm147_vm1, %v2937_v16, %v1264_v36 }
 0x5e3   :  { %v850_v52 = vpop.xlane.xlu2 %849 }
 0x5e4   :  { %2233 = vrcp.f32 %v850_v52 }
 0x5e5   :  { %2235 = vrcp.f32 %v853_v41 }
 0x5ea   :  { %v2234_v15 = vpop.eup %2233 }
 0x5eb   :  { %v876_v30 = vmul.f32 %v2234_v15, %v3072_v59  ;;  %v2236_v11 = vpop.eup %2235 }
 0x5ec   :  { %v877_v37 = vmul.f32 %v2236_v11, %v3064_v5 }
 0x5ed   :  { %1947 = vmatmul.msk.f32.gmra.mxu1 %vm229_vm2, %v876_v30 }
 0x5f5   :  { %v856_v40 = vpop.xlane.xlu1 %855  ;;  %1948 = vmatmul.msk.f32.gmra.mxu1 %vm229_vm2, %v877_v37 }
 0x5f6   :  { %2237 = vrcp.f32 %v856_v40 }
 0x5f8   :  { %v865_v58 = vpop.xlane.xlu2 %864 }
 0x5f9   :  { %2239 = vrcp.f32 %v865_v58 }
 0x5fc   :  { %v2238_v32 = vpop.eup %2237 }
 0x5fd   :  { %v859_v57 = vpop.xlane.xlu1 %858  ;;  %v878_v9 = vmul.f32 %v2238_v32, %v3079_v55 }
 0x5fe   :  { %2241 = vrcp.f32 %v859_v57 }
 0x5ff   :  { %v2240_v48 = vpop.eup %2239  ;;  %1949 = vmatmul.msk.f32.gmra.mxu1 %vm229_vm2, %v878_v9 }
 0x600   :  { %v881_v59 = vmul.f32 %v2240_v48, %v3083_v50 }
 0x602   :  { %1952 = vmatmul.msk.f32.vlgmr.msra.gmra.mxu2 %vm229_vm2, %v881_v59 }
 0x604   :  { %v2242_v10 = vpop.eup %2241 }
 0x605   :  { %v862_v5 = vpop.xlane.xlu1 %861  ;;  %v879_v26 = vmul.f32 %v2242_v10, %v3087_v20  ;;  %v686_v20 = vpop.f32.mrf.mxu1 }
 0x606   :  { %2243 = vrcp.f32 %v862_v5 }
 0x607   :  { %1950 = vmatmul.msk.f32.gmra.mxu1 %vm229_vm2, %v879_v26 }
 0x60c   :  { %v2244_v44 = vpop.eup %2243 }
 0x60d   :  { %v1147_v34 = vpop.xlane.xlu1 %1146  ;;  %v880_v55 = vmul.f32 %v2244_v44, %v3093_v12 }
 0x60e   :  { %2245 = vrcp.f32 %v1147_v34 }
 0x60f   :  { %1951 = vmatmul.msk.f32.gmra.mxu1 %vm229_vm2, %v880_v55 }
 0x614   :  { %v2246_v39 = vpop.eup %2245 }
 0x615   :  { %v1163_v50 = vmul.f32 %v2246_v39, %v3097_v56 }
 0x617   :  { %1976 = vmatmul.msk.f32.gmra.mxu0 %vm229_vm2, %v1163_v50 }
 0x629   :  { %v947_v1 = vpop.f32.mrf.mxu1 }
 0x62a   :  { %1293 = vrot.lane.b32.xlu2 %v947_v1, %s2283_s10 }
 0x62d   :  { %v1229_v22 = vpop.f32.mrf.mxu0 }
 0x62e   :  { %1325 = vrot.lane.b32.xlu1 %v1229_v22, %s2284_s11  ;;  %v1454_v22 = vld [vmem:[%s3431_s3 + $0x10] sm:$0xff] }
 0x631   :  { %v950_v12 = vpop.f32.mrf.mxu1 }
 0x632   :  { %1295 = vrot.lane.b32.xlu2 %v950_v12, %s2283_s10 }
 0x635   :  { %v1232_v51 = vpop.f32.mrf.mxu0 }
 0x636   :  { %1265 = vrot.lane.b32.xlu1 %v671_v14, %s2282_s9  ;;  %1327 = vrot.lane.b32.xlu0 %v1232_v51, %s2284_s11  ;;  %v1453_v51 = vld [vmem:[%s3431_s3 + $0x8] sm:$0xff] }
 0x63d   :  { %v1235_v56 = vpop.f32.mrf.mxu0 }
 0x63e   :  { %1267 = vrot.lane.b32.xlu1 %v674_v2, %s2282_s9  ;;  %1329 = vrot.lane.b32.xlu0 %v1235_v56, %s2284_s11 }
 0x645   :  { %v1238_v21 = vpop.f32.mrf.mxu0 }
 0x646   :  { %1269 = vrot.lane.b32.xlu1 %v677_v6, %s2282_s9  ;;  %1331 = vrot.lane.b32.xlu0 %v1238_v21, %s2284_s11  ;;  %v1452_v21 = vld [vmem:[%s3431_s3] sm:$0xff] }
 0x64d   :  { %v1241_v45 = vpop.f32.mrf.mxu0 }
 0x64e   :  { %1271 = vrot.lane.b32.xlu1 %v680_v3, %s2282_s9  ;;  %1333 = vrot.lane.b32.xlu0 %v1241_v45, %s2284_s11 }
 0x655   :  { %v1244_v27 = vpop.f32.mrf.mxu0 }
 0x656   :  { %1273 = vrot.lane.b32.xlu1 %v683_v24, %s2282_s9  ;;  %1335 = vrot.lane.b32.xlu0 %v1244_v27, %s2284_s11 }
 0x65d   :  { %v1247_v61 = vpop.f32.mrf.mxu0 }
 0x65e   :  { %1275 = vrot.lane.b32.xlu1 %v686_v20, %s2282_s9  ;;  %1337 = vrot.lane.b32.xlu0 %v1247_v61, %s2284_s11 }
 0x66a   :  { %v953_v38 = vpop.f32.mrf.mxu1 }
 0x66b   :  { %1297 = vrot.lane.b32.xlu2 %v953_v38, %s2283_s10 }
 0x672   :  { %v956_v13 = vpop.f32.mrf.mxu1 }
 0x673   :  { %1299 = vrot.lane.b32.xlu2 %v956_v13, %s2283_s10  ;;  %v2263_v13 = vld [vmem:[%s3428_s0] sm:$0xff] }
 0x67c   :  { %v959_v18 = vpop.f32.mrf.mxu1 }
 0x67d   :  { %1301 = vrot.lane.b32.xlu2 %v959_v18, %s2283_s10 }
 0x684   :  { %v962_v19 = vpop.f32.mrf.mxu1  ;;  %v1294_v4 = vpop.permute.xlu2 %1293 }
 0x685   :  { %1303 = vrot.lane.b32.xlu2 %v962_v19, %s2283_s10  ;;  %v968_v54 = vpop.f32.mrf.mxu2  ;;  %v1358_v23 = vsel %vm1357_vm3, %v1349_v25, %v1294_v4  ;;  %v2267_v4 = vld [vmem:[%s3428_s0 + $0x20] sm:$0xff] }
 0x68c   :  { %v965_v8 = vpop.f32.mrf.mxu1  ;;  %v1296_v47 = vpop.permute.xlu2 %1295 }
 0x68d   :  { %1305 = vrot.lane.b32.xlu2 %v965_v8, %s2283_s10  ;;  %v1359_v52 = vsel %vm1357_vm3, %v1350_v29, %v1296_v47  ;;  %v2269_v47 = vld [vmem:[%s3428_s0 + $0x30] sm:$0xff] }
 0x694   :  { %v1250_v17 = vpop.f32.mrf.mxu0 }
 0x695   :  { %1307 = vrot.lane.b32.xlu2 %v968_v54, %s2283_s10  ;;  %1339 = vrot.lane.b32.xlu0 %v1250_v17, %s2284_s11  ;;  %v2266_v54 = vld [vmem:[%s3428_s0 + $0x18] sm:$0xff] }
 0x6a0   :  { %v1326_v35 = vpop.permute.xlu1 %1325 }
 0x6a1   :  { %v1367_v31 = vsel %vm1366_vm4, %v1358_v23, %v1326_v35  ;;  %v2268_v23 = vld [vmem:[%s3428_s0 + $0x28] sm:$0xff] }
 0x6a2   :  { %1977 = vmatmul.msk.f32.vlgmr.msrb.gmra.mxu2 %vm41_vm0, %v1367_v31 }
 0x6a8   :  { %v1328_v41 = vpop.permute.xlu0 %1327  ;;  %v1266_v46 = vpop.permute.xlu1 %1265 }
 0x6a9   :  { %v1368_v15 = vsel %vm1366_vm4, %v1359_v52, %v1328_v41  ;;  %v1351_v11 = vsel %vm147_vm1, %v2943_v49, %v1266_v46  ;;  %v1608_v52 = vld [vmem:[%s3432_s4 + $0x78] sm:$0xff]  ;;  %v1607_v41 = vld [vmem:[%s3432_s4 + $0x70] sm:$0xff]  ;;  %v1605_v46 = vld [vmem:[%s3432_s4 + $0x60] sm:$0xff] }
 0x6aa   :  { %1978 = vmatmul.msk.f32.gmra.mxu2 %vm41_vm0, %v1368_v15  ;;  %1609 = vmatpush.msra.mxu3 %v1608_v52  ;;  %v1606_v15 = vld [vmem:[%s3432_s4 + $0x68] sm:$0xff] }
 0x6ac   :  { %1610 = vmatpush.msra.mxu3 %v1607_v41 }
 0x6ae   :  { %1611 = vmatpush.msra.mxu3 %v1606_v15 }
 0x6b0   :  { %v1330_v30 = vpop.permute.xlu0 %1329  ;;  %v1268_v40 = vpop.permute.xlu1 %1267  ;;  %1612 = vmatpush.msra.mxu3 %v1605_v46 }
 0x6b1   :  { %v1352_v57 = vsel %vm147_vm1, %v2947_v43, %v1268_v40  ;;  %v1601_v40 = vld [vmem:[%s3432_s4 + $0x40] sm:$0xff] }
 0x6b8   :  { %v1332_v16 = vpop.permute.xlu0 %1331  ;;  %v1270_v10 = vpop.permute.xlu1 %1269 }
 0x6b9   :  { %v1353_v5 = vsel %vm147_vm1, %v2951_v28, %v1270_v10  ;;  %v1596_v10 = vld [vmem:[%s3432_s4 + $0x18] sm:$0xff] }
 0x6c0   :  { %v1334_v49 = vpop.permute.xlu0 %1333  ;;  %v1272_v34 = vpop.permute.xlu1 %1271 }
 0x6c1   :  { %v1354_v55 = vsel %vm147_vm1, %v2953_v60, %v1272_v34  ;;  %v1455_v60 = vld [vmem:[%s3431_s3 + $0x18] sm:$0xff] }
 0x6c2   :  { %1492 = vmatpush.msrb.mxu1 %v1455_v60 }
 0x6c4   :  { %1493 = vmatpush.msrb.mxu1 %v1454_v22 }
 0x6c5   :  { %v1298_v37 = vpop.permute.xlu2 %1297 }
 0x6c6   :  { %v1360_v58 = vsel %vm1357_vm3, %v1351_v11, %v1298_v37  ;;  %1494 = vmatpush.msrb.mxu1 %v1453_v51  ;;  %v1603_v11 = vld [vmem:[%s3432_s4 + $0x50] sm:$0xff]  ;;  %v1602_v37 = vld [vmem:[%s3432_s4 + $0x48] sm:$0xff] }
 0x6c7   :  { %v1369_v32 = vsel %vm1366_vm4, %v1360_v58, %v1330_v30  ;;  %v1604_v30 = vld [vmem:[%s3432_s4 + $0x58] sm:$0xff] }
 0x6c8   :  { %1979 = vmatmul.msk.f32.gmra.mxu2 %vm41_vm0, %v1369_v32  ;;  %v1336_v43 = vpop.permute.xlu0 %1335  ;;  %v1274_v28 = vpop.permute.xlu1 %1273  ;;  %1495 = vmatpush.msrb.mxu1 %v1452_v21  ;;  %v1600_v32 = vld [vmem:[%s3432_s4 + $0x38] sm:$0xff] }
 0x6c9   :  { %v1355_v24 = vsel %vm147_vm1, %v2955_v53, %v1274_v28  ;;  %1613 = vmatpush.msra.mxu3 %v1604_v30 }
 0x6cb   :  { %1614 = vmatpush.msra.mxu3 %v1603_v11 }
 0x6cd   :  { %v1300_v9 = vpop.permute.xlu2 %1299  ;;  %1615 = vmatpush.msra.mxu3 %v1602_v37 }
 0x6ce   :  { %v1361_v48 = vsel %vm1357_vm3, %v1352_v57, %v1300_v9  ;;  %v1599_v9 = vld [vmem:[%s3432_s4 + $0x30] sm:$0xff] }
 0x6cf   :  { %v1370_v59 = vsel %vm1366_vm4, %v1361_v48, %v1332_v16  ;;  %1616 = vmatpush.msra.mxu3 %v1601_v40  ;;  %v2270_v16 = vld [vmem:[%s3428_s0 + $0x38] sm:$0xff]  ;;  %v1598_v48 = vld [vmem:[%s3432_s4 + $0x28] sm:$0xff] }
 0x6d0   :  { %1980 = vmatmul.msk.f32.gmra.mxu2 %vm41_vm0, %v1370_v59  ;;  %v1338_v20 = vpop.permute.xlu0 %1337  ;;  %v1276_v12 = vpop.permute.xlu1 %1275  ;;  %v1597_v59 = vld [vmem:[%s3432_s4 + $0x20] sm:$0xff] }
 0x6d1   :  { %v1356_v56 = vsel %vm147_vm1, %v2957_v63, %v1276_v12  ;;  %1617 = vmatpush.msra.mxu3 %v1600_v32 }
 0x6d3   :  { %1618 = vmatpush.msra.mxu3 %v1599_v9 }
 0x6d5   :  { %1619 = vmatpush.msra.mxu3 %v1598_v48 }
 0x6d7   :  { %v1302_v26 = vpop.permute.xlu2 %1301  ;;  %1620 = vmatpush.msra.mxu3 %v1597_v59 }
 0x6d8   :  { %v1362_v14 = vsel %vm1357_vm3, %v1353_v5, %v1302_v26  ;;  %v1594_v5 = vld [vmem:[%s3432_s4 + $0x8] sm:$0xff]  ;;  %v1593_v26 = vld [vmem:[%s3432_s4] sm:$0xff] }
 0x6d9   :  { %v1371_v44 = vsel %vm1366_vm4, %v1362_v14, %v1334_v49  ;;  %v1595_v49 = vld [vmem:[%s3432_s4 + $0x10] sm:$0xff]  ;;  %1621 = vmatpush.msra.mxu3 %v1596_v10 }
 0x6da   :  { %1981 = vmatmul.msk.f32.gmra.mxu2 %vm41_vm0, %v1371_v44 }
 0x6db   :  { %1622 = vmatpush.msra.mxu3 %v1595_v49 }
 0x6dd   :  { %1623 = vmatpush.msra.mxu3 %v1594_v5 }
 0x6df   :  { %v1304_v2 = vpop.permute.xlu2 %1303  ;;  %1624 = vmatpush.msra.mxu3 %v1593_v26 }
 0x6e0   :  { %v1363_v39 = vsel %vm1357_vm3, %v1354_v55, %v1304_v2 }
 0x6e1   :  { %v1372_v50 = vsel %vm1366_vm4, %v1363_v39, %v1336_v43 }
 0x6e2   :  { %1982 = vmatmul.msk.f32.gmra.mxu2 %vm41_vm0, %v1372_v50 }
 0x6e7   :  { %v1306_v6 = vpop.permute.xlu2 %1305 }
 0x6e8   :  { %v1364_v3 = vsel %vm1357_vm3, %v1355_v24, %v1306_v6 }
 0x6e9   :  { %v1373_v1 = vsel %vm1366_vm4, %v1364_v3, %v1338_v20 }
 0x6ea   :  { %1983 = vmatmul.msk.f32.gmra.mxu2 %vm41_vm0, %v1373_v1 }
 0x6ef   :  { %v1308_v53 = vpop.permute.xlu2 %1307 }
 0x6f0   :  { %v1365_v45 = vsel %vm1357_vm3, %v1356_v56, %v1308_v53 }
 0x707   :  { %v1340_v27 = vpop.permute.xlu0 %1339 }
 0x708   :  { %v1374_v61 = vsel %vm1366_vm4, %v1365_v45, %v1340_v27 }
 0x709   :  { %1984 = vmatmul.msk.f32.gmra.mxu2 %vm41_vm0, %v1374_v61 }
 0x725   :  { %v1420_v38 = vpop.f32.mrf.mxu2 }
 0x726   :  { %v3222_v7 = vadd.f32 %v2263_v13, %v1420_v38 }
 0x728   :  { %1985 = vmatmul.msk.f32.vlgmr.msrb.gmra.mxu1 %vm41_vm0, %v3222_v7 }
 0x72d   :  { %v1423_v63 = vpop.f32.mrf.mxu2 }
 0x72e   :  { %v3229_v62 = vadd.f32 %v2264_v42, %v1423_v63 }
 0x730   :  { %1986 = vmatmul.msk.f32.gmra.mxu1 %vm41_vm0, %v3229_v62 }
 0x74b   :  { %v1426_v18 = vpop.f32.mrf.mxu2 }
 0x74c   :  { %v3236_v19 = vadd.f32 %v2265_v0, %v1426_v18 }
 0x74e   :  { %1987 = vmatmul.msk.f32.gmra.mxu1 %vm41_vm0, %v3236_v19 }
 0x753   :  { %v1429_v8 = vpop.f32.mrf.mxu2 }
 0x754   :  { %v3243_v17 = vadd.f32 %v2266_v54, %v1429_v8 }
 0x756   :  { %1988 = vmatmul.msk.f32.gmra.mxu1 %vm41_vm0, %v3243_v17 }
 0x75d   :  { %v1432_v33 = vpop.f32.mrf.mxu2 }
 0x75e   :  { %v3250_v25 = vadd.f32 %v2267_v4, %v1432_v33 }
 0x760   :  { %1989 = vmatmul.msk.f32.gmra.mxu1 %vm41_vm0, %v3250_v25 }
 0x765   :  { %v1435_v36 = vpop.f32.mrf.mxu2 }
 0x766   :  { %v3257_v35 = vadd.f32 %v2268_v23, %v1435_v36 }
 0x768   :  { %1990 = vmatmul.msk.f32.gmra.mxu1 %vm41_vm0, %v3257_v35 }
 0x76d   :  { %v1438_v31 = vpop.f32.mrf.mxu2 }
 0x76e   :  { %v3264_v29 = vadd.f32 %v2269_v47, %v1438_v31 }
 0x770   :  { %1991 = vmatmul.msk.f32.gmra.mxu1 %vm41_vm0, %v3264_v29 }
 0x78c   :  { %v1441_v58 = vpop.f32.mrf.mxu2 }
 0x78d   :  { %v3298_v57 = vadd.f32 %v2270_v16, %v1441_v58 }
 0x78f   :  { %1992 = vmatmul.msk.f32.gmra.mxu1 %vm41_vm0, %v3298_v57 }
 0x7a5   :  { %v1497_v14 = vpop.f32.mrf.mxu1 }
 0x7a6   :  { %v1529_v44 = vmul.f32 0.044715, %v1497_v14  ;;  %v1521_v1 = vmul.f32 0.5, %v1497_v14 }
 0x7a8   :  { %v1537_v34 = vmul.f32 %v1529_v44, %v1497_v14 }
 0x7aa   :  { %v1545_v43 = vmul.f32 %v1537_v34, %v1497_v14 }
 0x7ac   :  { %v1553_v55 = vadd.f32 %v1545_v43, %v1497_v14 }
 0x7ad   :  { %v1500_v2 = vpop.f32.mrf.mxu1 }
 0x7ae   :  { %v1561_v39 = vmul.f32 0.7978846, %v1553_v55  ;;  %v1530_v50 = vmul.f32 0.044715, %v1500_v2  ;;  %v1522_v53 = vmul.f32 0.5, %v1500_v2 }
 0x7b0   :  { %2247 = vtanh.f32 %v1561_v39  ;;  %v1538_v28 = vmul.f32 %v1530_v50, %v1500_v2 }
 0x7b2   :  { %v1546_v24 = vmul.f32 %v1538_v28, %v1500_v2 }
 0x7b4   :  { %v1554_v6 = vadd.f32 %v1546_v24, %v1500_v2 }
 0x7b6   :  { %v2248_v20 = vpop.eup %2247  ;;  %v1562_v3 = vmul.f32 0.7978846, %v1554_v6 }
 0x7b7   :  { %v1577_v60 = vadd.f32 1.0, %v2248_v20 }
 0x7b8   :  { %2249 = vtanh.f32 %v1562_v3 }
 0x7b9   :  { %v1585_v22 = vmul.f32 %v1577_v60, %v1521_v1 }
 0x7bb   :  { %1625 = vmatmul.f32.vlgmr.msra.gmra.mxu3 %v1585_v22 }
 0x7be   :  { %v2250_v12 = vpop.eup %2249 }
 0x7bf   :  { %v1578_v51 = vadd.f32 1.0, %v2250_v12 }
 0x7c1   :  { %v1586_v56 = vmul.f32 %v1578_v51, %v1522_v53 }
 0x7c3   :  { %1628 = vmatmul.f32.gmra.mxu3 %v1586_v56 }
 0x7cb   :  { %v1503_v21 = vpop.f32.mrf.mxu1 }
 0x7cc   :  { %v1531_v45 = vmul.f32 0.044715, %v1503_v21  ;;  %v1523_v36 = vmul.f32 0.5, %v1503_v21 }
 0x7ce   :  { %v1539_v27 = vmul.f32 %v1531_v45, %v1503_v21 }
 0x7d0   :  { %v1547_v61 = vmul.f32 %v1539_v27, %v1503_v21 }
 0x7d2   :  { %v1555_v38 = vadd.f32 %v1547_v61, %v1503_v21 }
 0x7d3   :  { %v1506_v13 = vpop.f32.mrf.mxu1 }
 0x7d4   :  { %v1532_v63 = vmul.f32 0.044715, %v1506_v13  ;;  %v1563_v42 = vmul.f32 0.7978846, %v1555_v38  ;;  %v1524_v11 = vmul.f32 0.5, %v1506_v13 }
 0x7d6   :  { %v1540_v18 = vmul.f32 %v1532_v63, %v1506_v13  ;;  %2251 = vtanh.f32 %v1563_v42 }
 0x7d8   :  { %v1548_v0 = vmul.f32 %v1540_v18, %v1506_v13 }
 0x7da   :  { %v1556_v8 = vadd.f32 %v1548_v0, %v1506_v13 }
 0x7dc   :  { %v2252_v54 = vpop.eup %2251  ;;  %v1564_v33 = vmul.f32 0.7978846, %v1556_v8 }
 0x7dd   :  { %v1509_v4 = vpop.f32.mrf.mxu1  ;;  %v1579_v23 = vadd.f32 1.0, %v2252_v54 }
 0x7de   :  { %v1533_v31 = vmul.f32 0.044715, %v1509_v4  ;;  %2253 = vtanh.f32 %v1564_v33  ;;  %v1525_v26 = vmul.f32 0.5, %v1509_v4 }
 0x7df   :  { %v1587_v47 = vmul.f32 %v1579_v23, %v1523_v36 }
 0x7e0   :  { %v1541_v52 = vmul.f32 %v1533_v31, %v1509_v4 }
 0x7e1   :  { %1631 = vmatmul.f32.gmra.mxu3 %v1587_v47 }
 0x7e2   :  { %v1549_v41 = vmul.f32 %v1541_v52, %v1509_v4 }
 0x7e4   :  { %v2254_v15 = vpop.eup %2253  ;;  %v1557_v46 = vadd.f32 %v1549_v41, %v1509_v4  ;;  %v1665_v41 = vld [vmem:[%s3433_s7 + $0x38] sm:$0xff] }
 0x7e5   :  { %v1512_v30 = vpop.f32.mrf.mxu1  ;;  %v1580_v37 = vadd.f32 1.0, %v2254_v15  ;;  %v1734_v15 = vld [vmem:[%s3434_s5 + $0x18] sm:$0xff] }
 0x7e6   :  { %v1534_v40 = vmul.f32 0.044715, %v1512_v30  ;;  %v1565_v58 = vmul.f32 0.7978846, %v1557_v46  ;;  %v1526_v50 = vmul.f32 0.5, %v1512_v30  ;;  %1786 = vmatpush.msra.mxu1 %v1734_v15  ;;  %v1733_v46 = vld [vmem:[%s3434_s5 + $0x10] sm:$0xff] }
 0x7e7   :  { %v1588_v32 = vmul.f32 %v1580_v37, %v1524_v11  ;;  %v1731_v11 = vld [vmem:[%s3434_s5] sm:$0xff]  ;;  %v1738_v37 = vld [vmem:[%s3434_s5 + $0x38] sm:$0xff] }
 0x7e8   :  { %v1542_v16 = vmul.f32 %v1534_v40, %v1512_v30  ;;  %2255 = vtanh.f32 %v1565_v58  ;;  %1787 = vmatpush.msra.mxu1 %v1733_v46  ;;  %1757 = vmatpush.msra.mxu2 %v1738_v37  ;;  %v1737_v40 = vld [vmem:[%s3434_s5 + $0x30] sm:$0xff]  ;;  %v1736_v58 = vld [vmem:[%s3434_s5 + $0x28] sm:$0xff] }
 0x7e9   :  { %1634 = vmatmul.f32.gmra.mxu3 %v1588_v32  ;;  %v1735_v32 = vld [vmem:[%s3434_s5 + $0x20] sm:$0xff] }
 0x7ea   :  { %v1550_v9 = vmul.f32 %v1542_v16, %v1512_v30  ;;  %1758 = vmatpush.msra.mxu2 %v1737_v40  ;;  %v1800_v16 = vld [vmem:[%s3434_s5 + $0x58] sm:$0xff] }
 0x7ec   :  { %v1558_v48 = vadd.f32 %v1550_v9, %v1512_v30  ;;  %v1732_v30 = vld [vmem:[%s3434_s5 + $0x8] sm:$0xff]  ;;  %1759 = vmatpush.msra.mxu2 %v1736_v58  ;;  %v1799_v9 = vld [vmem:[%s3434_s5 + $0x50] sm:$0xff] }
 0x7ed   :  { %v1515_v59 = vpop.f32.mrf.mxu1  ;;  %1788 = vmatpush.msra.mxu1 %v1732_v30 }
 0x7ee   :  { %v2256_v10 = vpop.eup %2255  ;;  %v1535_v49 = vmul.f32 0.044715, %v1515_v59  ;;  %v1566_v5 = vmul.f32 0.7978846, %v1558_v48  ;;  %v1527_v20 = vmul.f32 0.5, %v1515_v59  ;;  %1760 = vmatpush.msra.mxu2 %v1735_v32  ;;  %v1798_v48 = vld [vmem:[%s3434_s5 + $0x48] sm:$0xff] }
 0x7ef   :  { %v1581_v14 = vadd.f32 1.0, %v2256_v10  ;;  %1789 = vmatpush.msra.mxu1 %v1731_v11  ;;  %v1835_v10 = vld [vmem:[%s3434_s5 + $0x78] sm:$0xff] }
 0x7f0   :  { %v1543_v44 = vmul.f32 %v1535_v49, %v1515_v59  ;;  %2257 = vtanh.f32 %v1566_v5  ;;  %1819 = vmatpush.msrb.mxu2 %v1800_v16  ;;  %v1797_v49 = vld [vmem:[%s3434_s5 + $0x40] sm:$0xff]  ;;  %1854 = vmatpush.msrb.mxu3 %v1835_v10 }
 0x7f1   :  { %v1589_v34 = vmul.f32 %v1581_v14, %v1525_v26  ;;  %v1834_v26 = vld [vmem:[%s3434_s5 + $0x70] sm:$0xff]  ;;  %v1833_v14 = vld [vmem:[%s3434_s5 + $0x68] sm:$0xff] }
 0x7f2   :  { %v1551_v43 = vmul.f32 %v1543_v44, %v1515_v59  ;;  %1820 = vmatpush.msrb.mxu2 %v1799_v9  ;;  %1855 = vmatpush.msrb.mxu3 %v1834_v26 }
 0x7f3   :  { %1637 = vmatmul.f32.gmra.mxu3 %v1589_v34  ;;  %v1832_v34 = vld [vmem:[%s3434_s5 + $0x60] sm:$0xff] }
 0x7f4   :  { %v1559_v55 = vadd.f32 %v1551_v43, %v1515_v59  ;;  %1821 = vmatpush.msrb.mxu2 %v1798_v48  ;;  %1856 = vmatpush.msrb.mxu3 %v1833_v14 }
 0x7f6   :  { %v2258_v2 = vpop.eup %2257  ;;  %v1567_v39 = vmul.f32 0.7978846, %v1559_v55  ;;  %1822 = vmatpush.msrb.mxu2 %v1797_v49  ;;  %1857 = vmatpush.msrb.mxu3 %v1832_v34 }
 0x7f7   :  { %v1582_v28 = vadd.f32 1.0, %v2258_v2 }
 0x7f8   :  { %2259 = vtanh.f32 %v1567_v39 }
 0x7f9   :  { %v1590_v24 = vmul.f32 %v1582_v28, %v1526_v50 }
 0x7fb   :  { %1640 = vmatmul.f32.gmra.mxu3 %v1590_v24 }
 0x7fe   :  { %v2260_v6 = vpop.eup %2259 }
 0x7ff   :  { %v1583_v3 = vadd.f32 1.0, %v2260_v6 }
 0x801   :  { %v1591_v1 = vmul.f32 %v1583_v3, %v1527_v20 }
 0x803   :  { %1643 = vmatmul.f32.gmra.mxu3 %v1591_v1 }
 0x80c   :  { %v1518_v60 = vpop.f32.mrf.mxu1 }
 0x80d   :  { %v1536_v22 = vmul.f32 0.044715, %v1518_v60  ;;  %v1528_v45 = vmul.f32 0.5, %v1518_v60 }
 0x80f   :  { %v1544_v12 = vmul.f32 %v1536_v22, %v1518_v60 }
 0x811   :  { %v1552_v53 = vmul.f32 %v1544_v12, %v1518_v60 }
 0x813   :  { %v1560_v51 = vadd.f32 %v1552_v53, %v1518_v60 }
 0x815   :  { %v1568_v56 = vmul.f32 0.7978846, %v1560_v51 }
 0x817   :  { %2261 = vtanh.f32 %v1568_v56 }
 0x81d   :  { %v2262_v21 = vpop.eup %2261 }
 0x81e   :  { %v1584_v27 = vadd.f32 1.0, %v2262_v21 }
 0x820   :  { %v1592_v61 = vmul.f32 %v1584_v27, %v1528_v45 }
 0x822   :  { %1646 = vmatmul.f32.gmra.mxu3 %v1592_v61 }
 0x83e   :  { %v1626_v38 = vpop.f32.mrf.mxu3 }
 0x846   :  { %v1629_v13 = vpop.f32.mrf.mxu3 }
 0x847   :  { %v1651_v52 = vadd.f32 %v1629_v13, %v3229_v62  ;;  %v1660_v62 = vld [vmem:[%s3433_s7 + $0x10] sm:$0xff] }
 0x864   :  { %v1632_v63 = vpop.f32.mrf.mxu3 }
 0x865   :  { %v1652_v47 = vadd.f32 %v1632_v63, %v3236_v19  ;;  %v1662_v19 = vld [vmem:[%s3433_s7 + $0x20] sm:$0xff] }
 0x86c   :  { %v1635_v42 = vpop.f32.mrf.mxu3 }
 0x86d   :  { %v1653_v31 = vadd.f32 %v1635_v42, %v3243_v17  ;;  %v1659_v17 = vld [vmem:[%s3433_s7 + $0x8] sm:$0xff] }
 0x876   :  { %v1638_v18 = vpop.f32.mrf.mxu3 }
 0x877   :  { %v1654_v23 = vadd.f32 %v1638_v18, %v3250_v25  ;;  %v1663_v25 = vld [vmem:[%s3433_s7 + $0x28] sm:$0xff] }
 0x87e   :  { %v1641_v0 = vpop.f32.mrf.mxu3 }
 0x87f   :  { %v1655_v36 = vadd.f32 %v1641_v0, %v3257_v35  ;;  %v1658_v35 = vld [vmem:[%s3433_s7] sm:$0xff] }
 0x886   :  { %v1644_v8 = vpop.f32.mrf.mxu3 }
 0x887   :  { %v1656_v4 = vadd.f32 %v1644_v8, %v3264_v29  ;;  %v1664_v29 = vld [vmem:[%s3433_s7 + $0x30] sm:$0xff] }
 0x8a5   :  { %v1647_v54 = vpop.f32.mrf.mxu3 }
 0x8a6   :  { %v1657_v33 = vadd.f32 %v1647_v54, %v3298_v57  ;;  %v1650_v57 = vadd.f32 %v1626_v38, %v3222_v7  ;;  %v1661_v7 = vld [vmem:[%s3433_s7 + $0x18] sm:$0xff] }
 0x8a8   :  { %1698 = vmatpush.msrb.mxu0 %v1657_v33 }
 0x8aa   :  { %1699 = vmatpush.msrb.mxu0 %v1656_v4 }
 0x8ac   :  { %1700 = vmatpush.msrb.mxu0 %v1655_v36 }
 0x8ae   :  { %1701 = vmatpush.msrb.mxu0 %v1654_v23 }
 0x8b0   :  { %1702 = vmatpush.msrb.mxu0 %v1653_v31 }
 0x8b2   :  { %1703 = vmatpush.msrb.mxu0 %v1652_v47 }
 0x8b4   :  { %1704 = vmatpush.msrb.mxu0 %v1651_v52 }
 0x8b6   :  { %1705 = vmatpush.msrb.mxu0 %v1650_v57 }
 0x8b7   :  { %1993 = vmatmul.msk.f32.vlgmr.msrb.gmra.mxu0 %vm229_vm2, %v1658_v35 }
 0x8bf   :  { %1994 = vmatmul.msk.f32.gmra.mxu0 %vm229_vm2, %v1659_v17 }
 0x8c7   :  { %1995 = vmatmul.msk.f32.gmra.mxu0 %vm229_vm2, %v1660_v62 }
 0x8cf   :  { %1996 = vmatmul.msk.f32.gmra.mxu0 %vm229_vm2, %v1661_v7 }
 0x8d7   :  { %1997 = vmatmul.msk.f32.gmra.mxu0 %vm229_vm2, %v1662_v19 }
 0x8df   :  { %1998 = vmatmul.msk.f32.gmra.mxu0 %vm229_vm2, %v1663_v25 }
 0x8e7   :  { %1999 = vmatmul.msk.f32.gmra.mxu0 %vm229_vm2, %v1664_v29 }
 0x8ef   :  { %2000 = vmatmul.msk.f32.gmra.mxu0 %vm229_vm2, %v1665_v41 }
 0x934   :  { %v1707_v59 = vpop.f32.mrf.mxu0 }
 0x935   :  { %2003 = vmatmul.msk.f32.vlgmr.msra.gmra.mxu1 %vm41_vm0, %v1707_v59 }
 0x93c   :  { %v1710_v5 = vpop.f32.mrf.mxu0 }
 0x93d   :  { %2004 = vmatmul.msk.f32.gmra.mxu1 %vm41_vm0, %v1710_v5 }
 0x944   :  { %v1713_v44 = vpop.f32.mrf.mxu0 }
 0x945   :  { %2001 = vmatmul.msk.f32.vlgmr.msra.gmra.mxu2 %vm41_vm0, %v1713_v44 }
 0x94c   :  { %v1716_v43 = vpop.f32.mrf.mxu0 }
 0x94d   :  { %2002 = vmatmul.msk.f32.gmra.mxu2 %vm41_vm0, %v1716_v43 }
 0x954   :  { %v1719_v55 = vpop.f32.mrf.mxu0 }
 0x955   :  { %2005 = vmatmul.msk.f32.vlgmr.msrb.gmra.mxu2 %vm41_vm0, %v1719_v55 }
 0x95c   :  { %v1722_v2 = vpop.f32.mrf.mxu0 }
 0x95d   :  { %2006 = vmatmul.msk.f32.gmra.mxu2 %vm41_vm0, %v1722_v2 }
 0x964   :  { %v1725_v39 = vpop.f32.mrf.mxu0 }
 0x965   :  { %2007 = vmatmul.msk.f32.vlgmr.msrb.gmra.mxu3 %vm41_vm0, %v1725_v39 }
 0x96c   :  { %v1728_v50 = vpop.f32.mrf.mxu0 }
 0x96d   :  { %2008 = vmatmul.msk.f32.gmra.mxu3 %vm41_vm0, %v1728_v50 }
 0x9b2   :  { %v1791_v6 = vpop.f32.mrf.mxu1 }
 0x9ba   :  { %v1794_v12 = vpop.f32.mrf.mxu1 }
 0x9c8   :  { %v1762_v28 = vpop.f32.mrf.mxu2 }
 0x9c9   :  { %v1792_v3 = vadd.f32 %v1791_v6, %v1762_v28 }
 0x9d0   :  { %v1765_v24 = vpop.f32.mrf.mxu2 }
 0x9d1   :  { %v1795_v51 = vadd.f32 %v1794_v12, %v1765_v24 }
 0x9d8   :  { %v1824_v20 = vpop.f32.mrf.mxu2 }
 0x9d9   :  { %v1830_v1 = vadd.f32 %v1824_v20, %v1792_v3 }
 0x9e0   :  { %v1827_v53 = vpop.f32.mrf.mxu2 }
 0x9e1   :  { %v1831_v56 = vadd.f32 %v1827_v53, %v1795_v51 }
 0x9e8   :  { %v1859_v60 = vpop.f32.mrf.mxu3 }
 0x9e9   :  { %v1865_v22 = vadd.f32 %v1859_v60, %v1830_v1 }
 0x9eb   :  { %1867 = vst.msk [vmem:[%s3435_s8] sm:$0xff] %vm1357_vm3, %v1865_v22 }
 0x9f0   :  { %v1862_v21 = vpop.f32.mrf.mxu3 }
 0x9f1   :  { %v1866_v45 = vadd.f32 %v1862_v21, %v1831_v56 }
 0x9f3   :  { %1868 = vst.msk [vmem:[%s3435_s8 + $0x8] sm:$0xff] %vm1357_vm3, %v1866_v45 }

</bundles_post_ra>
